<compile_context>
chip_gen: v5e
topology: v5e:2x2
jax: 0.10.0
libtpu: 0.0.40
codegen_flags: <defaults>
</compile_context>

<pallas_src>
import functools
import math

import jax
import jax.numpy as jnp
from jax.experimental import pallas as pl
from jax.experimental.pallas import tpu as pltpu

NEG_INF = -1e9


# ----------------------------------------------------------------------------
# In-kernel helpers (traced into the fused kernel; f32 vector math, bf16 MXU inputs)
# ----------------------------------------------------------------------------
def _layer_norm(x, g, b):
    mu = jnp.mean(x, axis=-1, keepdims=True)
    var = jnp.mean(jnp.square(x - mu), axis=-1, keepdims=True)
    return (x - mu) * jax.lax.rsqrt(var + 1e-5) * g + b


def _ffn(x, w1, b1, w2, b2):
    h = jnp.dot(x.astype(jnp.bfloat16), w1, preferred_element_type=jnp.float32) + b1
    h = jax.nn.gelu(h, approximate=True)
    return jnp.dot(h.astype(jnp.bfloat16), w2, preferred_element_type=jnp.float32) + b2


def _mha(q, k, v, mask, wo, bo, num_heads, scale):
    """q:[Sq,D], k,v:[Sk,D] f32; mask broadcastable to [Sq,Sk]; wo:[D,D] bf16; bo:[1,D] f32.

    Per-head scores + softmax (per-head K is tiny and pads to a full MXU tile either way),
    but a SINGLE [Sq,D]x[D,D] output-projection matmul (perf-review item).  The per-head
    context matmul runs over the full value width and is lane-masked into place, so there is
    no lane-axis concatenation and no per-head wo slice.
    """
    Sq, D = q.shape
    dh = D // num_heads
    v_bf = v.astype(jnp.bfloat16)
    lane = jax.lax.broadcasted_iota(jnp.int32, (1, D), 1)
    ctx = jnp.zeros((Sq, D), jnp.float32)
    for h in range(num_heads):                       # static unroll, num_heads is tiny
        sl = slice(h * dh, (h + 1) * dh)
        s = jax.lax.dot_general(
            q[:, sl].astype(jnp.bfloat16), k[:, sl].astype(jnp.bfloat16),
            (((1,), (1,)), ((), ())), preferred_element_type=jnp.float32) * scale + mask
        s = s - jnp.max(s, axis=-1, keepdims=True)
        e = jnp.exp(s)
        p = e * pl.reciprocal(jnp.sum(e, axis=-1, keepdims=True), approx=True)
        ctx_h = jnp.dot(p.astype(jnp.bfloat16), v_bf, preferred_element_type=jnp.float32)
        head_mask = jnp.logical_and(lane >= h * dh, lane < (h + 1) * dh)
        ctx = ctx + jnp.where(head_mask, ctx_h, 0.0)
    return jnp.dot(ctx.astype(jnp.bfloat16), wo, preferred_element_type=jnp.float32) + bo


# ----------------------------------------------------------------------------
# Single fused kernel: embeddings + encoder layer + decoder layer + LM head + masked CE.
# One grid step per batch item (parallel -> one item per TensorCore on v7x).
# ----------------------------------------------------------------------------
def _degree_fused_kernel(
        # per-batch data blocks
        enc_ids_ref, enc_attn_ref, dec_ids_ref, dec_attn_ref, lbl_ref,
        # shared tables
        embed_ref, pos_e_ref, pos_d_ref,
        # encoder layer weights
        e_wqkv, e_bqkv, e_wo, e_bo, e_ln1g, e_ln1b,
        e_w1, e_b1, e_w2, e_b2, e_ln2g, e_ln2b,
        # decoder layer weights
        d_wqkv, d_bqkv, d_wos, d_bos, d_ln1g, d_ln1b,
        d_wqc, d_bqc, d_wkvc, d_bkvc, d_woc, d_boc, d_ln2g, d_ln2b,
        d_w1, d_b1, d_w2, d_b2, d_ln3g, d_ln3b,
        # LM head bias
        lm_bias_ref,
        # output: lane-dense (1,1,128) slab -> lane0 = sum NLL, lane1 = valid-label count
        out_ref, *, num_heads):
    Se = enc_ids_ref.shape[1]
    Sd = dec_ids_ref.shape[1]
    V, D = embed_ref.shape
    scale = 1.0 / math.sqrt(D // num_heads)

    embed = embed_ref[...]                                         # [V, D] f32 (tied weights)

    # ---- token embeddings via one-hot MXU gather + positional add (no XLA gather ops) ----
    viota_e = jax.lax.broadcasted_iota(jnp.int32, (Se, V), 1)
    enc_x = jnp.dot((enc_ids_ref[0] == viota_e).astype(jnp.float32), embed,
                    preferred_element_type=jnp.float32) + pos_e_ref[...]      # [Se, D]
    viota_d = jax.lax.broadcasted_iota(jnp.int32, (Sd, V), 1)
    dec_x = jnp.dot((dec_ids_ref[0] == viota_d).astype(jnp.float32), embed,
                    preferred_element_type=jnp.float32) + pos_d_ref[...]      # [Sd, D]

    # key masks built in-kernel from [1,S] attention vectors
    enc_key = jnp.where(enc_attn_ref[0] > 0.0, 0.0, NEG_INF)                  # [1, Se]
    dec_key = jnp.where(dec_attn_ref[0] > 0.0, 0.0, NEG_INF)                  # [1, Sd]

    # ---- encoder layer (fused QKV matmul) ----
    qkv = jnp.dot(enc_x.astype(jnp.bfloat16), e_wqkv[...],
                  preferred_element_type=jnp.float32) + e_bqkv[...]           # [Se, 3D]
    q, k, v = qkv[:, :D], qkv[:, D:2 * D], qkv[:, 2 * D:]
    sa = _mha(q, k, v, enc_key, e_wo[...], e_bo[...], num_heads, scale)
    h1 = _layer_norm(enc_x + sa, e_ln1g[...], e_ln1b[...])
    ff = _ffn(h1, e_w1[...], e_b1[...], e_w2[...], e_b2[...])
    enc_out = _layer_norm(h1 + ff, e_ln2g[...], e_ln2b[...])                  # [Se, D]

    # ---- decoder layer: causal self-attn, cross-attn (fused KV matmul), FFN ----
    row = jax.lax.broadcasted_iota(jnp.int32, (Sd, Sd), 0)
    col = jax.lax.broadcasted_iota(jnp.int32, (Sd, Sd), 1)
    self_mask = jnp.where(col <= row, 0.0, NEG_INF) + dec_key                 # [Sd, Sd]

    qkv_d = jnp.dot(dec_x.astype(jnp.bfloat16), d_wqkv[...],
                    preferred_element_type=jnp.float32) + d_bqkv[...]
    qd, kd, vd = qkv_d[:, :D], qkv_d[:, D:2 * D], qkv_d[:, 2 * D:]
    sa_d = _mha(qd, kd, vd, self_mask, d_wos[...], d_bos[...], num_heads, scale)
    g1 = _layer_norm(dec_x + sa_d, d_ln1g[...], d_ln1b[...])

    qc = jnp.dot(g1.astype(jnp.bfloat16), d_wqc[...],
                 preferred_element_type=jnp.float32) + d_bqc[...]             # [Sd, D]
    kvc = jnp.dot(enc_out.astype(jnp.bfloat16), d_wkvc[...],
                  preferred_element_type=jnp.float32) + d_bkvc[...]           # [Se, 2D]
    ca = _mha(qc, kvc[:, :D], kvc[:, D:], enc_key, d_woc[...], d_boc[...], num_heads, scale)
    g2 = _layer_norm(g1 + ca, d_ln2g[...], d_ln2b[...])

    ff_d = _ffn(g2, d_w1[...], d_b1[...], d_w2[...], d_b2[...])
    dec_out = _layer_norm(g2 + ff_d, d_ln3g[...], d_ln3b[...])                # [Sd, D]

    # ---- tied LM head + masked cross-entropy (V == one 128-lane tile: single pass, no
    #      online accumulators; logits never leave VMEM) ----
    logits = jax.lax.dot_general(
        dec_out.astype(jnp.bfloat16), embed.astype(jnp.bfloat16),
        (((1,), (1,)), ((), ())), preferred_element_type=jnp.float32) + lm_bias_ref[...]  # [Sd,V]

    lbl = lbl_ref[0]                                                          # [Sd, 1] int32
    valid = (lbl >= 0).astype(jnp.float32)                                    # -100 => ignored
    lab_logit = jnp.sum(jnp.where(viota_d == lbl, logits, 0.0), axis=-1, keepdims=True)
    m = jnp.max(logits, axis=-1, keepdims=True)
    lse = m + jnp.log(jnp.sum(jnp.exp(logits - m), axis=-1, keepdims=True))
    nll_sum = jnp.sum((lse - lab_logit) * valid, axis=0, keepdims=True)       # [1, 1]
    cnt = jnp.sum(valid, axis=0, keepdims=True)                               # [1, 1]

    lane_o = jax.lax.broadcasted_iota(jnp.int32, (1, 128), 1)
    out_ref[0] = jnp.where(lane_o == 0, nll_sum, jnp.where(lane_o == 1, cnt, 0.0))


# ----------------------------------------------------------------------------
# pallas_call wrapper (single launch for the whole forward pass)
# ----------------------------------------------------------------------------
def _full_spec(a):
    zero = (0,) * a.ndim
    return pl.BlockSpec(a.shape, lambda b: zero)


def degree_forward(params, enc_idxs, enc_attn, dec_idxs, dec_attn, lbl_idxs, num_heads):
    B, Se = enc_idxs.shape
    Sd = dec_idxs.shape[1]
    V, D = params["embed"].shape

    # [B,S,1] id/label columns and [B,1,S] attention rows keep the last-two block dims equal
    # to the full array dims (satisfies the (8,128)/full-dim BlockSpec rule at tiny shapes).
    enc_ids3 = enc_idxs.reshape(B, Se, 1).astype(jnp.int32)
    dec_ids3 = dec_idxs.reshape(B, Sd, 1).astype(jnp.int32)
    lbl3 = lbl_idxs.reshape(B, Sd, 1).astype(jnp.int32)
    enc_attn3 = enc_attn.astype(jnp.float32).reshape(B, 1, Se)
    dec_attn3 = dec_attn.astype(jnp.float32).reshape(B, 1, Sd)

    enc_p, dec_p = params["enc"], params["dec"]
    consts = (
        params["embed"], params["pos"][:Se], params["pos"][:Sd],
        enc_p["wqkv"], enc_p["bqkv"], enc_p["wo"], enc_p["bo"],
        enc_p["ln1_g"], enc_p["ln1_b"],
        enc_p["w1"], enc_p["b1"], enc_p["w2"], enc_p["b2"],
        enc_p["ln2_g"], enc_p["ln2_b"],
        dec_p["wqkv"], dec_p["bqkv"], dec_p["wo_s"], dec_p["bo_s"],
        dec_p["ln1_g"], dec_p["ln1_b"],
        dec_p["wq_c"], dec_p["bq_c"], dec_p["wkv_c"], dec_p["bkv_c"],
        dec_p["wo_c"], dec_p["bo_c"], dec_p["ln2_g"], dec_p["ln2_b"],
        dec_p["w1"], dec_p["b1"], dec_p["w2"], dec_p["b2"],
        dec_p["ln3_g"], dec_p["ln3_b"],
        params["lm_bias"],
    )

    out = pl.pallas_call(
        functools.partial(_degree_fused_kernel, num_heads=num_heads),
        out_shape=jax.ShapeDtypeStruct((B, 1, 128), jnp.float32),
        grid=(B,),
        in_specs=[
            pl.BlockSpec((1, Se, 1), lambda b: (b, 0, 0)),
            pl.BlockSpec((1, 1, Se), lambda b: (b, 0, 0)),
            pl.BlockSpec((1, Sd, 1), lambda b: (b, 0, 0)),
            pl.BlockSpec((1, 1, Sd), lambda b: (b, 0, 0)),
            pl.BlockSpec((1, Sd, 1), lambda b: (b, 0, 0)),
        ] + [_full_spec(w) for w in consts],
        out_specs=pl.BlockSpec((1, 1, 128), lambda b: (b, 0, 0)),
        compiler_params=pltpu.CompilerParams(dimension_semantics=("parallel",)),
    )(enc_ids3, enc_attn3, dec_ids3, dec_attn3, lbl3, *consts)

    # Tiny XLA finish: sum per-batch (nll_sum, count) partials and divide.  Kept outside the
    # kernel because the batch grid axis stays "parallel" (v7x core split) so there is no
    # in-kernel cross-batch reduction; guards the all-ignored-label 0/0 case.
    nll_total = jnp.sum(out[:, 0, 0])
    cnt_total = jnp.sum(out[:, 0, 1])
    return nll_total / jnp.maximum(cnt_total, 1.0)


# ----------------------------------------------------------------------------
# Deterministic parameter init (matmul weights stored bf16 for the MXU, f32 accumulation)
# ----------------------------------------------------------------------------
def _winit(key, din, dout, scale=0.02):
    return (scale * jax.random.normal(key, (din, dout), jnp.float32)).astype(jnp.bfloat16)


def init_params(key, V, D, F, max_pos):
    ks = jax.random.split(key, 14)
    ones = lambda n=None: jnp.ones((1, D if n is None else n), jnp.float32)
    zeros = lambda n=None: jnp.zeros((1, D if n is None else n), jnp.float32)

    params = {
        "embed": 0.02 * jax.random.normal(ks[0], (V, D), jnp.float32),   # tied LM head weight
        "pos": 0.02 * jax.random.normal(ks[1], (max_pos, D), jnp.float32),
        "lm_bias": jnp.zeros((1, V), jnp.float32),                       # final_logits_bias
        "enc": {
            "wqkv": _winit(ks[2], D, 3 * D), "bqkv": zeros(3 * D),
            "wo": _winit(ks[3], D, D), "bo": zeros(),
            "ln1_g": ones(), "ln1_b": zeros(),
            "w1": _winit(ks[4], D, F), "b1": zeros(F),
            "w2": _winit(ks[5], F, D), "b2": zeros(),
            "ln2_g": ones(), "ln2_b": zeros(),
        },
        "dec": {
            "wqkv": _winit(ks[6], D, 3 * D), "bqkv": zeros(3 * D),
            "wo_s": _winit(ks[7], D, D), "bo_s": zeros(),
            "ln1_g": ones(), "ln1_b": zeros(),
            "wq_c": _winit(ks[8], D, D), "bq_c": zeros(),
            "wkv_c": _winit(ks[9], D, 2 * D), "bkv_c": zeros(2 * D),
            "wo_c": _winit(ks[10], D, D), "bo_c": zeros(),
            "ln2_g": ones(), "ln2_b": zeros(),
            "w1": _winit(ks[11], D, F), "b1": zeros(F),
            "w2": _winit(ks[12], F, D), "b2": zeros(),
            "ln3_g": ones(), "ln3_b": zeros(),
        },
    }
    return params


# ----------------------------------------------------------------------------
# process_data analog (BART branch: prepend eos to decoder, build -100 labels)
# ----------------------------------------------------------------------------
def build_batch(key, B, Se, T, V, pad_id, eos_id):
    k1, k2 = jax.random.split(key)
    enc_lens = jnp.array([Se, Se - 2], jnp.int32)[:B]
    enc_tok = jax.random.randint(k1, (B, Se), 3, V, jnp.int32)
    enc_pos = jnp.arange(Se)[None, :]
    enc_attn = (enc_pos < enc_lens[:, None]).astype(jnp.int32)
    enc_idxs = jnp.where(enc_attn > 0, enc_tok, pad_id)

    tgt_lens = jnp.array([T, T - 2], jnp.int32)[:B]
    tgt_tok = jax.random.randint(k2, (B, T), 3, V, jnp.int32)
    tgt_pos = jnp.arange(T)[None, :]
    tgt_attn = (tgt_pos < tgt_lens[:, None]).astype(jnp.int32)
    tgt_idxs = jnp.where(tgt_attn > 0, tgt_tok, pad_id)

    eos_col = jnp.full((B, 1), eos_id, jnp.int32)
    dec_idxs = jnp.concatenate([eos_col, tgt_idxs], axis=1)                       # [B, T+1]
    dec_attn = jnp.concatenate([jnp.ones((B, 1), jnp.int32), tgt_attn], axis=1)   # [B, T+1]

    pad_col = jnp.full((B, 1), pad_id, jnp.int32)
    raw_lbl_idxs = jnp.concatenate([dec_idxs[:, 1:], pad_col], axis=1)
    lbl_attn = jnp.concatenate([dec_attn[:, 1:], jnp.zeros((B, 1), jnp.int32)], axis=1)
    lbl_idxs = jnp.where(lbl_attn == 0, -100, raw_lbl_idxs)
    return enc_idxs, enc_attn, dec_idxs, dec_attn, raw_lbl_idxs, lbl_idxs


if __name__ == "__main__":
    # small shapes: batch=2, enc_seq=8, target_seq=7 (dec_seq=8), hidden=32, heads=2,
    # ffn=64, vocab=128
    B, Se, T = 2, 8, 7
    V, D, F, H = 128, 32, 64, 2
    pad_id, eos_id = 1, 2

    key = jax.random.PRNGKey(0)
    k_param, k_data = jax.random.split(key)
    params = init_params(k_param, V, D, F, max_pos=16)
    enc_idxs, enc_attn, dec_idxs, dec_attn, raw_lbl_idxs, lbl_idxs = build_batch(
        k_data, B, Se, T, V, pad_id, eos_id)

    fwd = jax.jit(functools.partial(degree_forward, num_heads=H))
    loss = jax.block_until_ready(fwd(params, enc_idxs, enc_attn, dec_idxs, dec_attn, lbl_idxs))
    assert jnp.isfinite(loss), "loss is not finite"
    print("KERNEL_OK")
</pallas_src>

<mosaic_0001>
module attributes {stable_mosaic.version = 11 : i64} {
  func.func @_degree_fused_kernel(%arg0: i32, %arg1: memref<1x8x1xi32, #tpu.memory_space<vmem>>, %arg2: memref<1x1x8xf32, #tpu.memory_space<vmem>>, %arg3: memref<1x8x1xi32, #tpu.memory_space<vmem>>, %arg4: memref<1x1x8xf32, #tpu.memory_space<vmem>>, %arg5: memref<1x8x1xi32, #tpu.memory_space<vmem>>, %arg6: memref<128x32xf32, #tpu.memory_space<vmem>>, %arg7: memref<8x32xf32, #tpu.memory_space<vmem>>, %arg8: memref<8x32xf32, #tpu.memory_space<vmem>>, %arg9: memref<32x96xbf16, #tpu.memory_space<vmem>>, %arg10: memref<1x96xf32, #tpu.memory_space<vmem>>, %arg11: memref<32x32xbf16, #tpu.memory_space<vmem>>, %arg12: memref<1x32xf32, #tpu.memory_space<vmem>>, %arg13: memref<1x32xf32, #tpu.memory_space<vmem>>, %arg14: memref<1x32xf32, #tpu.memory_space<vmem>>, %arg15: memref<32x64xbf16, #tpu.memory_space<vmem>>, %arg16: memref<1x64xf32, #tpu.memory_space<vmem>>, %arg17: memref<64x32xbf16, #tpu.memory_space<vmem>>, %arg18: memref<1x32xf32, #tpu.memory_space<vmem>>, %arg19: memref<1x32xf32, #tpu.memory_space<vmem>>, %arg20: memref<1x32xf32, #tpu.memory_space<vmem>>, %arg21: memref<32x96xbf16, #tpu.memory_space<vmem>>, %arg22: memref<1x96xf32, #tpu.memory_space<vmem>>, %arg23: memref<32x32xbf16, #tpu.memory_space<vmem>>, %arg24: memref<1x32xf32, #tpu.memory_space<vmem>>, %arg25: memref<1x32xf32, #tpu.memory_space<vmem>>, %arg26: memref<1x32xf32, #tpu.memory_space<vmem>>, %arg27: memref<32x32xbf16, #tpu.memory_space<vmem>>, %arg28: memref<1x32xf32, #tpu.memory_space<vmem>>, %arg29: memref<32x64xbf16, #tpu.memory_space<vmem>>, %arg30: memref<1x64xf32, #tpu.memory_space<vmem>>, %arg31: memref<32x32xbf16, #tpu.memory_space<vmem>>, %arg32: memref<1x32xf32, #tpu.memory_space<vmem>>, %arg33: memref<1x32xf32, #tpu.memory_space<vmem>>, %arg34: memref<1x32xf32, #tpu.memory_space<vmem>>, %arg35: memref<32x64xbf16, #tpu.memory_space<vmem>>, %arg36: memref<1x64xf32, #tpu.memory_space<vmem>>, %arg37: memref<64x32xbf16, #tpu.memory_space<vmem>>, %arg38: memref<1x32xf32, #tpu.memory_space<vmem>>, %arg39: memref<1x32xf32, #tpu.memory_space<vmem>>, %arg40: memref<1x32xf32, #tpu.memory_space<vmem>>, %arg41: memref<1x128xf32, #tpu.memory_space<vmem>>, %arg42: memref<1x1x128xf32, #tpu.memory_space<vmem>>) attributes {dimension_semantics = [#tpu.dimension_semantics<parallel>], iteration_bounds = array<i64: 2>, scalar_prefetch = 0 : i64, scratch_operands = 0 : i64, tpu.core_type = #tpu.core_type<tc>, window_params = [{transform_indices = @transform_0, window_bounds = array<i64: 1, 8, 1>}, {transform_indices = @transform_1, window_bounds = array<i64: 1, 1, 8>}, {transform_indices = @transform_2, window_bounds = array<i64: 1, 8, 1>}, {transform_indices = @transform_3, window_bounds = array<i64: 1, 1, 8>}, {transform_indices = @transform_4, window_bounds = array<i64: 1, 8, 1>}, {pipeline_mode = #tpu.pipeline_mode<synchronous>, transform_indices = @transform_5, window_bounds = array<i64: 128, 32>}, {pipeline_mode = #tpu.pipeline_mode<synchronous>, transform_indices = @transform_6, window_bounds = array<i64: 8, 32>}, {pipeline_mode = #tpu.pipeline_mode<synchronous>, transform_indices = @transform_7, window_bounds = array<i64: 8, 32>}, {pipeline_mode = #tpu.pipeline_mode<synchronous>, transform_indices = @transform_8, window_bounds = array<i64: 32, 96>}, {pipeline_mode = #tpu.pipeline_mode<synchronous>, transform_indices = @transform_9, window_bounds = array<i64: 1, 96>}, {pipeline_mode = #tpu.pipeline_mode<synchronous>, transform_indices = @transform_10, window_bounds = array<i64: 32, 32>}, {pipeline_mode = #tpu.pipeline_mode<synchronous>, transform_indices = @transform_11, window_bounds = array<i64: 1, 32>}, {pipeline_mode = #tpu.pipeline_mode<synchronous>, transform_indices = @transform_12, window_bounds = array<i64: 1, 32>}, {pipeline_mode = #tpu.pipeline_mode<synchronous>, transform_indices = @transform_13, window_bounds = array<i64: 1, 32>}, {pipeline_mode = #tpu.pipeline_mode<synchronous>, transform_indices = @transform_14, window_bounds = array<i64: 32, 64>}, {pipeline_mode = #tpu.pipeline_mode<synchronous>, transform_indices = @transform_15, window_bounds = array<i64: 1, 64>}, {pipeline_mode = #tpu.pipeline_mode<synchronous>, transform_indices = @transform_16, window_bounds = array<i64: 64, 32>}, {pipeline_mode = #tpu.pipeline_mode<synchronous>, transform_indices = @transform_17, window_bounds = array<i64: 1, 32>}, {pipeline_mode = #tpu.pipeline_mode<synchronous>, transform_indices = @transform_18, window_bounds = array<i64: 1, 32>}, {pipeline_mode = #tpu.pipeline_mode<synchronous>, transform_indices = @transform_19, window_bounds = array<i64: 1, 32>}, {pipeline_mode = #tpu.pipeline_mode<synchronous>, transform_indices = @transform_20, window_bounds = array<i64: 32, 96>}, {pipeline_mode = #tpu.pipeline_mode<synchronous>, transform_indices = @transform_21, window_bounds = array<i64: 1, 96>}, {pipeline_mode = #tpu.pipeline_mode<synchronous>, transform_indices = @transform_22, window_bounds = array<i64: 32, 32>}, {pipeline_mode = #tpu.pipeline_mode<synchronous>, transform_indices = @transform_23, window_bounds = array<i64: 1, 32>}, {pipeline_mode = #tpu.pipeline_mode<synchronous>, transform_indices = @transform_24, window_bounds = array<i64: 1, 32>}, {pipeline_mode = #tpu.pipeline_mode<synchronous>, transform_indices = @transform_25, window_bounds = array<i64: 1, 32>}, {pipeline_mode = #tpu.pipeline_mode<synchronous>, transform_indices = @transform_26, window_bounds = array<i64: 32, 32>}, {pipeline_mode = #tpu.pipeline_mode<synchronous>, transform_indices = @transform_27, window_bounds = array<i64: 1, 32>}, {pipeline_mode = #tpu.pipeline_mode<synchronous>, transform_indices = @transform_28, window_bounds = array<i64: 32, 64>}, {pipeline_mode = #tpu.pipeline_mode<synchronous>, transform_indices = @transform_29, window_bounds = array<i64: 1, 64>}, {pipeline_mode = #tpu.pipeline_mode<synchronous>, transform_indices = @transform_30, window_bounds = array<i64: 32, 32>}, {pipeline_mode = #tpu.pipeline_mode<synchronous>, transform_indices = @transform_31, window_bounds = array<i64: 1, 32>}, {pipeline_mode = #tpu.pipeline_mode<synchronous>, transform_indices = @transform_32, window_bounds = array<i64: 1, 32>}, {pipeline_mode = #tpu.pipeline_mode<synchronous>, transform_indices = @transform_33, window_bounds = array<i64: 1, 32>}, {pipeline_mode = #tpu.pipeline_mode<synchronous>, transform_indices = @transform_34, window_bounds = array<i64: 32, 64>}, {pipeline_mode = #tpu.pipeline_mode<synchronous>, transform_indices = @transform_35, window_bounds = array<i64: 1, 64>}, {pipeline_mode = #tpu.pipeline_mode<synchronous>, transform_indices = @transform_36, window_bounds = array<i64: 64, 32>}, {pipeline_mode = #tpu.pipeline_mode<synchronous>, transform_indices = @transform_37, window_bounds = array<i64: 1, 32>}, {pipeline_mode = #tpu.pipeline_mode<synchronous>, transform_indices = @transform_38, window_bounds = array<i64: 1, 32>}, {pipeline_mode = #tpu.pipeline_mode<synchronous>, transform_indices = @transform_39, window_bounds = array<i64: 1, 32>}, {pipeline_mode = #tpu.pipeline_mode<synchronous>, transform_indices = @transform_40, window_bounds = array<i64: 1, 128>}, {transform_indices = @transform_41, window_bounds = array<i64: 1, 1, 128>}]} {
    %c0 = arith.constant 0 : index
    %c0_0 = arith.constant 0 : index
    %0 = vector.load %arg6[%c0, %c0_0] : memref<128x32xf32, #tpu.memory_space<vmem>>, vector<128x32xf32>
    %1 = tpu.iota {dimensions = array<i32: 1>} : vector<8x128xi32>
    %c0_1 = arith.constant 0 : index
    %c0_2 = arith.constant 0 : index
    %c0_3 = arith.constant 0 : index
    %2 = vector.load %arg1[%c0_1, %c0_2, %c0_3] : memref<1x8x1xi32, #tpu.memory_space<vmem>>, vector<1x8x1xi32>
    %3 = vector.shape_cast %2 : vector<1x8x1xi32> to vector<8x1xi32>
    %4 = vector.broadcast %3 : vector<8x1xi32> to vector<8x128xi32>
    %5 = arith.cmpi eq, %4, %1 : vector<8x128xi32>
    %6 = arith.extui %5 : vector<8x128xi1> to vector<8x128xi32>
    %7 = arith.sitofp %6 : vector<8x128xi32> to vector<8x128xf32>
    %cst = arith.constant dense<0.000000e+00> : vector<8x32xf32>
    %8 = tpu.matmul %7, %0, %cst {dimension_numbers = #tpu.dot_dimension_numbers<[1], [0], [0], [1], [0, 0, 1, 1], [], []>} : vector<8x128xf32>, vector<128x32xf32>, vector<8x32xf32> -> vector<8x32xf32>
    %c0_4 = arith.constant 0 : index
    %c0_5 = arith.constant 0 : index
    %9 = vector.load %arg7[%c0_4, %c0_5] : memref<8x32xf32, #tpu.memory_space<vmem>>, vector<8x32xf32>
    %10 = arith.addf %8, %9 : vector<8x32xf32>
    %11 = tpu.iota {dimensions = array<i32: 1>} : vector<8x128xi32>
    %c0_6 = arith.constant 0 : index
    %c0_7 = arith.constant 0 : index
    %c0_8 = arith.constant 0 : index
    %12 = vector.load %arg3[%c0_6, %c0_7, %c0_8] : memref<1x8x1xi32, #tpu.memory_space<vmem>>, vector<1x8x1xi32>
    %13 = vector.shape_cast %12 : vector<1x8x1xi32> to vector<8x1xi32>
    %14 = vector.broadcast %13 : vector<8x1xi32> to vector<8x128xi32>
    %15 = arith.cmpi eq, %14, %11 : vector<8x128xi32>
    %16 = arith.extui %15 : vector<8x128xi1> to vector<8x128xi32>
    %17 = arith.sitofp %16 : vector<8x128xi32> to vector<8x128xf32>
    %cst_9 = arith.constant dense<0.000000e+00> : vector<8x32xf32>
    %18 = tpu.matmul %17, %0, %cst_9 {dimension_numbers = #tpu.dot_dimension_numbers<[1], [0], [0], [1], [0, 0, 1, 1], [], []>} : vector<8x128xf32>, vector<128x32xf32>, vector<8x32xf32> -> vector<8x32xf32>
    %c0_10 = arith.constant 0 : index
    %c0_11 = arith.constant 0 : index
    %19 = vector.load %arg8[%c0_10, %c0_11] : memref<8x32xf32, #tpu.memory_space<vmem>>, vector<8x32xf32>
    %20 = arith.addf %18, %19 : vector<8x32xf32>
    %c0_12 = arith.constant 0 : index
    %c0_13 = arith.constant 0 : index
    %c0_14 = arith.constant 0 : index
    %21 = vector.load %arg2[%c0_12, %c0_13, %c0_14] : memref<1x1x8xf32, #tpu.memory_space<vmem>>, vector<1x1x8xf32>
    %22 = vector.shape_cast %21 : vector<1x1x8xf32> to vector<1x8xf32>
    %cst_15 = arith.constant 0.000000e+00 : f32
    %23 = vector.broadcast %cst_15 : f32 to vector<1x8xf32>
    %24 = arith.cmpf ogt, %22, %23 : vector<1x8xf32>
    %cst_16 = arith.constant 0.000000e+00 : f32
    %cst_17 = arith.constant -1.000000e+09 : f32
    %25 = vector.broadcast %cst_16 : f32 to vector<1x8xf32>
    %26 = vector.broadcast %cst_17 : f32 to vector<1x8xf32>
    %27 = arith.select %24, %25, %26 : vector<1x8xi1>, vector<1x8xf32>
    %c0_18 = arith.constant 0 : index
    %c0_19 = arith.constant 0 : index
    %c0_20 = arith.constant 0 : index
    %28 = vector.load %arg4[%c0_18, %c0_19, %c0_20] : memref<1x1x8xf32, #tpu.memory_space<vmem>>, vector<1x1x8xf32>
    %29 = vector.shape_cast %28 : vector<1x1x8xf32> to vector<1x8xf32>
    %cst_21 = arith.constant 0.000000e+00 : f32
    %30 = vector.broadcast %cst_21 : f32 to vector<1x8xf32>
    %31 = arith.cmpf ogt, %29, %30 : vector<1x8xf32>
    %cst_22 = arith.constant 0.000000e+00 : f32
    %cst_23 = arith.constant -1.000000e+09 : f32
    %32 = vector.broadcast %cst_22 : f32 to vector<1x8xf32>
    %33 = vector.broadcast %cst_23 : f32 to vector<1x8xf32>
    %34 = arith.select %31, %32, %33 : vector<1x8xi1>, vector<1x8xf32>
    %35 = arith.truncf %10 : vector<8x32xf32> to vector<8x32xbf16>
    %c0_24 = arith.constant 0 : index
    %c0_25 = arith.constant 0 : index
    %36 = vector.load %arg9[%c0_24, %c0_25] : memref<32x96xbf16, #tpu.memory_space<vmem>>, vector<32x96xbf16>
    %cst_26 = arith.constant dense<0.000000e+00> : vector<8x96xf32>
    %37 = tpu.matmul %35, %36, %cst_26 {dimension_numbers = #tpu.dot_dimension_numbers<[1], [0], [0], [1], [0, 0, 1, 1], [], []>} : vector<8x32xbf16>, vector<32x96xbf16>, vector<8x96xf32> -> vector<8x96xf32>
    %c0_27 = arith.constant 0 : index
    %c0_28 = arith.constant 0 : index
    %38 = vector.load %arg10[%c0_27, %c0_28] : memref<1x96xf32, #tpu.memory_space<vmem>>, vector<1x96xf32>
    %39 = vector.broadcast %38 : vector<1x96xf32> to vector<8x96xf32>
    %40 = arith.addf %37, %39 : vector<8x96xf32>
    %41 = vector.extract_strided_slice %40 {offsets = [0, 0], sizes = [8, 32], strides = [1, 1]} : vector<8x96xf32> to vector<8x32xf32>
    %42 = vector.extract_strided_slice %40 {offsets = [0, 32], sizes = [8, 32], strides = [1, 1]} : vector<8x96xf32> to vector<8x32xf32>
    %43 = vector.extract_strided_slice %40 {offsets = [0, 64], sizes = [8, 32], strides = [1, 1]} : vector<8x96xf32> to vector<8x32xf32>
    %c0_29 = arith.constant 0 : index
    %c0_30 = arith.constant 0 : index
    %44 = vector.load %arg11[%c0_29, %c0_30] : memref<32x32xbf16, #tpu.memory_space<vmem>>, vector<32x32xbf16>
    %c0_31 = arith.constant 0 : index
    %c0_32 = arith.constant 0 : index
    %45 = vector.load %arg12[%c0_31, %c0_32] : memref<1x32xf32, #tpu.memory_space<vmem>>, vector<1x32xf32>
    %46 = arith.truncf %43 : vector<8x32xf32> to vector<8x32xbf16>
    %47 = tpu.iota {dimensions = array<i32: 1>} : vector<1x32xi32>
    %cst_33 = arith.constant 0.000000e+00 : f32
    %48 = vector.broadcast %cst_33 : f32 to vector<8x32xf32>
    %49 = vector.extract_strided_slice %41 {offsets = [0, 0], sizes = [8, 16], strides = [1, 1]} : vector<8x32xf32> to vector<8x16xf32>
    %50 = arith.truncf %49 : vector<8x16xf32> to vector<8x16xbf16>
    %51 = vector.extract_strided_slice %42 {offsets = [0, 0], sizes = [8, 16], strides = [1, 1]} : vector<8x32xf32> to vector<8x16xf32>
    %52 = arith.truncf %51 : vector<8x16xf32> to vector<8x16xbf16>
    %cst_34 = arith.constant dense<0.000000e+00> : vector<8x8xf32>
    %53 = tpu.matmul %50, %52, %cst_34 {dimension_numbers = #tpu.dot_dimension_numbers<[1], [1], [0], [0], [0, 0, 1, 0], [], []>} : vector<8x16xbf16>, vector<8x16xbf16>, vector<8x8xf32> -> vector<8x8xf32>
    %cst_35 = arith.constant 2.500000e-01 : f32
    %54 = vector.broadcast %cst_35 : f32 to vector<8x8xf32>
    %55 = arith.mulf %53, %54 : vector<8x8xf32>
    %56 = vector.broadcast %27 : vector<1x8xf32> to vector<8x8xf32>
    %57 = arith.addf %55, %56 : vector<8x8xf32>
    %cst_36 = arith.constant dense<0xFF800000> : vector<8xf32>
    %58 = vector.multi_reduction <maximumf>, %57, %cst_36 [1] : vector<8x8xf32> to vector<8xf32>
    %59 = vector.shape_cast %58 : vector<8xf32> to vector<8x1xf32>
    %60 = vector.broadcast %59 : vector<8x1xf32> to vector<8x8xf32>
    %61 = arith.subf %57, %60 : vector<8x8xf32>
    %62 = math.exp %61 : vector<8x8xf32>
    %cst_37 = arith.constant dense<0.000000e+00> : vector<8xf32>
    %63 = vector.multi_reduction <add>, %62, %cst_37 [1] : vector<8x8xf32> to vector<8xf32>
    %64 = vector.shape_cast %63 : vector<8xf32> to vector<8x1xf32>
    %65 = tpu.reciprocal %64 {approx = true} : vector<8x1xf32> -> vector<8x1xf32>
    %66 = vector.broadcast %65 : vector<8x1xf32> to vector<8x8xf32>
    %67 = arith.mulf %62, %66 : vector<8x8xf32>
    %68 = arith.truncf %67 : vector<8x8xf32> to vector<8x8xbf16>
    %cst_38 = arith.constant dense<0.000000e+00> : vector<8x32xf32>
    %69 = tpu.matmul %68, %46, %cst_38 {dimension_numbers = #tpu.dot_dimension_numbers<[1], [0], [0], [1], [0, 0, 1, 1], [], []>} : vector<8x8xbf16>, vector<8x32xbf16>, vector<8x32xf32> -> vector<8x32xf32>
    %c0_i32 = arith.constant 0 : i32
    %70 = vector.broadcast %c0_i32 : i32 to vector<1x32xi32>
    %71 = arith.cmpi sge, %47, %70 : vector<1x32xi32>
    %c16_i32 = arith.constant 16 : i32
    %72 = vector.broadcast %c16_i32 : i32 to vector<1x32xi32>
    %73 = arith.cmpi slt, %47, %72 : vector<1x32xi32>
    %74 = arith.andi %71, %73 : vector<1x32xi1>
    %cst_39 = arith.constant 0.000000e+00 : f32
    %75 = vector.shape_cast %74 : vector<1x32xi1> to vector<1x32xi1>
    %76 = vector.broadcast %75 : vector<1x32xi1> to vector<8x32xi1>
    %77 = vector.broadcast %cst_39 : f32 to vector<8x32xf32>
    %78 = arith.select %76, %69, %77 : vector<8x32xi1>, vector<8x32xf32>
    %79 = arith.addf %48, %78 : vector<8x32xf32>
    %80 = vector.extract_strided_slice %41 {offsets = [0, 16], sizes = [8, 16], strides = [1, 1]} : vector<8x32xf32> to vector<8x16xf32>
    %81 = arith.truncf %80 : vector<8x16xf32> to vector<8x16xbf16>
    %82 = vector.extract_strided_slice %42 {offsets = [0, 16], sizes = [8, 16], strides = [1, 1]} : vector<8x32xf32> to vector<8x16xf32>
    %83 = arith.truncf %82 : vector<8x16xf32> to vector<8x16xbf16>
    %cst_40 = arith.constant dense<0.000000e+00> : vector<8x8xf32>
    %84 = tpu.matmul %81, %83, %cst_40 {dimension_numbers = #tpu.dot_dimension_numbers<[1], [1], [0], [0], [0, 0, 1, 0], [], []>} : vector<8x16xbf16>, vector<8x16xbf16>, vector<8x8xf32> -> vector<8x8xf32>
    %cst_41 = arith.constant 2.500000e-01 : f32
    %85 = vector.broadcast %cst_41 : f32 to vector<8x8xf32>
    %86 = arith.mulf %84, %85 : vector<8x8xf32>
    %87 = vector.broadcast %27 : vector<1x8xf32> to vector<8x8xf32>
    %88 = arith.addf %86, %87 : vector<8x8xf32>
    %cst_42 = arith.constant dense<0xFF800000> : vector<8xf32>
    %89 = vector.multi_reduction <maximumf>, %88, %cst_42 [1] : vector<8x8xf32> to vector<8xf32>
    %90 = vector.shape_cast %89 : vector<8xf32> to vector<8x1xf32>
    %91 = vector.broadcast %90 : vector<8x1xf32> to vector<8x8xf32>
    %92 = arith.subf %88, %91 : vector<8x8xf32>
    %93 = math.exp %92 : vector<8x8xf32>
    %cst_43 = arith.constant dense<0.000000e+00> : vector<8xf32>
    %94 = vector.multi_reduction <add>, %93, %cst_43 [1] : vector<8x8xf32> to vector<8xf32>
    %95 = vector.shape_cast %94 : vector<8xf32> to vector<8x1xf32>
    %96 = tpu.reciprocal %95 {approx = true} : vector<8x1xf32> -> vector<8x1xf32>
    %97 = vector.broadcast %96 : vector<8x1xf32> to vector<8x8xf32>
    %98 = arith.mulf %93, %97 : vector<8x8xf32>
    %99 = arith.truncf %98 : vector<8x8xf32> to vector<8x8xbf16>
    %cst_44 = arith.constant dense<0.000000e+00> : vector<8x32xf32>
    %100 = tpu.matmul %99, %46, %cst_44 {dimension_numbers = #tpu.dot_dimension_numbers<[1], [0], [0], [1], [0, 0, 1, 1], [], []>} : vector<8x8xbf16>, vector<8x32xbf16>, vector<8x32xf32> -> vector<8x32xf32>
    %c16_i32_45 = arith.constant 16 : i32
    %101 = vector.broadcast %c16_i32_45 : i32 to vector<1x32xi32>
    %102 = arith.cmpi sge, %47, %101 : vector<1x32xi32>
    %c32_i32 = arith.constant 32 : i32
    %103 = vector.broadcast %c32_i32 : i32 to vector<1x32xi32>
    %104 = arith.cmpi slt, %47, %103 : vector<1x32xi32>
    %105 = arith.andi %102, %104 : vector<1x32xi1>
    %cst_46 = arith.constant 0.000000e+00 : f32
    %106 = vector.shape_cast %105 : vector<1x32xi1> to vector<1x32xi1>
    %107 = vector.broadcast %106 : vector<1x32xi1> to vector<8x32xi1>
    %108 = vector.broadcast %cst_46 : f32 to vector<8x32xf32>
    %109 = arith.select %107, %100, %108 : vector<8x32xi1>, vector<8x32xf32>
    %110 = arith.addf %79, %109 : vector<8x32xf32>
    %111 = arith.truncf %110 : vector<8x32xf32> to vector<8x32xbf16>
    %cst_47 = arith.constant dense<0.000000e+00> : vector<8x32xf32>
    %112 = tpu.matmul %111, %44, %cst_47 {dimension_numbers = #tpu.dot_dimension_numbers<[1], [0], [0], [1], [0, 0, 1, 1], [], []>} : vector<8x32xbf16>, vector<32x32xbf16>, vector<8x32xf32> -> vector<8x32xf32>
    %113 = vector.broadcast %45 : vector<1x32xf32> to vector<8x32xf32>
    %114 = arith.addf %112, %113 : vector<8x32xf32>
    %115 = arith.addf %10, %114 : vector<8x32xf32>
    %c0_48 = arith.constant 0 : index
    %c0_49 = arith.constant 0 : index
    %116 = vector.load %arg13[%c0_48, %c0_49] : memref<1x32xf32, #tpu.memory_space<vmem>>, vector<1x32xf32>
    %c0_50 = arith.constant 0 : index
    %c0_51 = arith.constant 0 : index
    %117 = vector.load %arg14[%c0_50, %c0_51] : memref<1x32xf32, #tpu.memory_space<vmem>>, vector<1x32xf32>
    %cst_52 = arith.constant dense<0.000000e+00> : vector<8xf32>
    %118 = vector.multi_reduction <add>, %115, %cst_52 [1] : vector<8x32xf32> to vector<8xf32>
    %119 = vector.shape_cast %118 : vector<8xf32> to vector<8x1xf32>
    %cst_53 = arith.constant 3.200000e+01 : f32
    %120 = vector.broadcast %cst_53 : f32 to vector<8x1xf32>
    %121 = arith.divf %119, %120 : vector<8x1xf32>
    %122 = vector.broadcast %121 : vector<8x1xf32> to vector<8x32xf32>
    %123 = arith.subf %115, %122 : vector<8x32xf32>
    %124 = arith.mulf %123, %123 : vector<8x32xf32>
    %cst_54 = arith.constant dense<0.000000e+00> : vector<8xf32>
    %125 = vector.multi_reduction <add>, %124, %cst_54 [1] : vector<8x32xf32> to vector<8xf32>
    %126 = vector.shape_cast %125 : vector<8xf32> to vector<8x1xf32>
    %cst_55 = arith.constant 3.200000e+01 : f32
    %127 = vector.broadcast %cst_55 : f32 to vector<8x1xf32>
    %128 = arith.divf %126, %127 : vector<8x1xf32>
    %129 = vector.broadcast %121 : vector<8x1xf32> to vector<8x32xf32>
    %130 = arith.subf %115, %129 : vector<8x32xf32>
    %cst_56 = arith.constant 9.99999974E-6 : f32
    %131 = vector.broadcast %cst_56 : f32 to vector<8x1xf32>
    %132 = arith.addf %128, %131 : vector<8x1xf32>
    %133 = math.rsqrt %132 : vector<8x1xf32>
    %134 = vector.broadcast %133 : vector<8x1xf32> to vector<8x32xf32>
    %135 = arith.mulf %130, %134 : vector<8x32xf32>
    %136 = vector.broadcast %116 : vector<1x32xf32> to vector<8x32xf32>
    %137 = arith.mulf %135, %136 : vector<8x32xf32>
    %138 = vector.broadcast %117 : vector<1x32xf32> to vector<8x32xf32>
    %139 = arith.addf %137, %138 : vector<8x32xf32>
    %c0_57 = arith.constant 0 : index
    %c0_58 = arith.constant 0 : index
    %140 = vector.load %arg15[%c0_57, %c0_58] : memref<32x64xbf16, #tpu.memory_space<vmem>>, vector<32x64xbf16>
    %c0_59 = arith.constant 0 : index
    %c0_60 = arith.constant 0 : index
    %141 = vector.load %arg16[%c0_59, %c0_60] : memref<1x64xf32, #tpu.memory_space<vmem>>, vector<1x64xf32>
    %c0_61 = arith.constant 0 : index
    %c0_62 = arith.constant 0 : index
    %142 = vector.load %arg17[%c0_61, %c0_62] : memref<64x32xbf16, #tpu.memory_space<vmem>>, vector<64x32xbf16>
    %c0_63 = arith.constant 0 : index
    %c0_64 = arith.constant 0 : index
    %143 = vector.load %arg18[%c0_63, %c0_64] : memref<1x32xf32, #tpu.memory_space<vmem>>, vector<1x32xf32>
    %144 = arith.truncf %139 : vector<8x32xf32> to vector<8x32xbf16>
    %cst_65 = arith.constant dense<0.000000e+00> : vector<8x64xf32>
    %145 = tpu.matmul %144, %140, %cst_65 {dimension_numbers = #tpu.dot_dimension_numbers<[1], [0], [0], [1], [0, 0, 1, 1], [], []>} : vector<8x32xbf16>, vector<32x64xbf16>, vector<8x64xf32> -> vector<8x64xf32>
    %146 = vector.broadcast %141 : vector<1x64xf32> to vector<8x64xf32>
    %147 = arith.addf %145, %146 : vector<8x64xf32>
    %148 = arith.mulf %147, %147 : vector<8x64xf32>
    %149 = arith.mulf %147, %148 : vector<8x64xf32>
    %cst_66 = arith.constant 4.471500e-02 : f32
    %150 = vector.broadcast %cst_66 : f32 to vector<8x64xf32>
    %151 = arith.mulf %150, %149 : vector<8x64xf32>
    %152 = arith.addf %147, %151 : vector<8x64xf32>
    %cst_67 = arith.constant 0.797884583 : f32
    %153 = vector.broadcast %cst_67 : f32 to vector<8x64xf32>
    %154 = arith.mulf %153, %152 : vector<8x64xf32>
    %155 = math.tanh %154 : vector<8x64xf32>
    %cst_68 = arith.constant 1.000000e+00 : f32
    %156 = vector.broadcast %cst_68 : f32 to vector<8x64xf32>
    %157 = arith.addf %156, %155 : vector<8x64xf32>
    %cst_69 = arith.constant 5.000000e-01 : f32
    %158 = vector.broadcast %cst_69 : f32 to vector<8x64xf32>
    %159 = arith.mulf %158, %157 : vector<8x64xf32>
    %160 = arith.mulf %147, %159 : vector<8x64xf32>
    %161 = arith.truncf %160 : vector<8x64xf32> to vector<8x64xbf16>
    %cst_70 = arith.constant dense<0.000000e+00> : vector<8x32xf32>
    %162 = tpu.matmul %161, %142, %cst_70 {dimension_numbers = #tpu.dot_dimension_numbers<[1], [0], [0], [1], [0, 0, 1, 1], [], []>} : vector<8x64xbf16>, vector<64x32xbf16>, vector<8x32xf32> -> vector<8x32xf32>
    %163 = vector.broadcast %143 : vector<1x32xf32> to vector<8x32xf32>
    %164 = arith.addf %162, %163 : vector<8x32xf32>
    %165 = arith.addf %139, %164 : vector<8x32xf32>
    %c0_71 = arith.constant 0 : index
    %c0_72 = arith.constant 0 : index
    %166 = vector.load %arg19[%c0_71, %c0_72] : memref<1x32xf32, #tpu.memory_space<vmem>>, vector<1x32xf32>
    %c0_73 = arith.constant 0 : index
    %c0_74 = arith.constant 0 : index
    %167 = vector.load %arg20[%c0_73, %c0_74] : memref<1x32xf32, #tpu.memory_space<vmem>>, vector<1x32xf32>
    %cst_75 = arith.constant dense<0.000000e+00> : vector<8xf32>
    %168 = vector.multi_reduction <add>, %165, %cst_75 [1] : vector<8x32xf32> to vector<8xf32>
    %169 = vector.shape_cast %168 : vector<8xf32> to vector<8x1xf32>
    %cst_76 = arith.constant 3.200000e+01 : f32
    %170 = vector.broadcast %cst_76 : f32 to vector<8x1xf32>
    %171 = arith.divf %169, %170 : vector<8x1xf32>
    %172 = vector.broadcast %171 : vector<8x1xf32> to vector<8x32xf32>
    %173 = arith.subf %165, %172 : vector<8x32xf32>
    %174 = arith.mulf %173, %173 : vector<8x32xf32>
    %cst_77 = arith.constant dense<0.000000e+00> : vector<8xf32>
    %175 = vector.multi_reduction <add>, %174, %cst_77 [1] : vector<8x32xf32> to vector<8xf32>
    %176 = vector.shape_cast %175 : vector<8xf32> to vector<8x1xf32>
    %cst_78 = arith.constant 3.200000e+01 : f32
    %177 = vector.broadcast %cst_78 : f32 to vector<8x1xf32>
    %178 = arith.divf %176, %177 : vector<8x1xf32>
    %179 = vector.broadcast %171 : vector<8x1xf32> to vector<8x32xf32>
    %180 = arith.subf %165, %179 : vector<8x32xf32>
    %cst_79 = arith.constant 9.99999974E-6 : f32
    %181 = vector.broadcast %cst_79 : f32 to vector<8x1xf32>
    %182 = arith.addf %178, %181 : vector<8x1xf32>
    %183 = math.rsqrt %182 : vector<8x1xf32>
    %184 = vector.broadcast %183 : vector<8x1xf32> to vector<8x32xf32>
    %185 = arith.mulf %180, %184 : vector<8x32xf32>
    %186 = vector.broadcast %166 : vector<1x32xf32> to vector<8x32xf32>
    %187 = arith.mulf %185, %186 : vector<8x32xf32>
    %188 = vector.broadcast %167 : vector<1x32xf32> to vector<8x32xf32>
    %189 = arith.addf %187, %188 : vector<8x32xf32>
    %190 = tpu.iota {dimensions = array<i32: 0>} : vector<8x8xi32>
    %191 = tpu.iota {dimensions = array<i32: 1>} : vector<8x8xi32>
    %192 = arith.cmpi sle, %191, %190 : vector<8x8xi32>
    %cst_80 = arith.constant 0.000000e+00 : f32
    %cst_81 = arith.constant -1.000000e+09 : f32
    %193 = vector.broadcast %cst_80 : f32 to vector<8x8xf32>
    %194 = vector.broadcast %cst_81 : f32 to vector<8x8xf32>
    %195 = arith.select %192, %193, %194 : vector<8x8xi1>, vector<8x8xf32>
    %196 = vector.broadcast %34 : vector<1x8xf32> to vector<8x8xf32>
    %197 = arith.addf %195, %196 : vector<8x8xf32>
    %198 = arith.truncf %20 : vector<8x32xf32> to vector<8x32xbf16>
    %c0_82 = arith.constant 0 : index
    %c0_83 = arith.constant 0 : index
    %199 = vector.load %arg21[%c0_82, %c0_83] : memref<32x96xbf16, #tpu.memory_space<vmem>>, vector<32x96xbf16>
    %cst_84 = arith.constant dense<0.000000e+00> : vector<8x96xf32>
    %200 = tpu.matmul %198, %199, %cst_84 {dimension_numbers = #tpu.dot_dimension_numbers<[1], [0], [0], [1], [0, 0, 1, 1], [], []>} : vector<8x32xbf16>, vector<32x96xbf16>, vector<8x96xf32> -> vector<8x96xf32>
    %c0_85 = arith.constant 0 : index
    %c0_86 = arith.constant 0 : index
    %201 = vector.load %arg22[%c0_85, %c0_86] : memref<1x96xf32, #tpu.memory_space<vmem>>, vector<1x96xf32>
    %202 = vector.broadcast %201 : vector<1x96xf32> to vector<8x96xf32>
    %203 = arith.addf %200, %202 : vector<8x96xf32>
    %204 = vector.extract_strided_slice %203 {offsets = [0, 0], sizes = [8, 32], strides = [1, 1]} : vector<8x96xf32> to vector<8x32xf32>
    %205 = vector.extract_strided_slice %203 {offsets = [0, 32], sizes = [8, 32], strides = [1, 1]} : vector<8x96xf32> to vector<8x32xf32>
    %206 = vector.extract_strided_slice %203 {offsets = [0, 64], sizes = [8, 32], strides = [1, 1]} : vector<8x96xf32> to vector<8x32xf32>
    %c0_87 = arith.constant 0 : index
    %c0_88 = arith.constant 0 : index
    %207 = vector.load %arg23[%c0_87, %c0_88] : memref<32x32xbf16, #tpu.memory_space<vmem>>, vector<32x32xbf16>
    %c0_89 = arith.constant 0 : index
    %c0_90 = arith.constant 0 : index
    %208 = vector.load %arg24[%c0_89, %c0_90] : memref<1x32xf32, #tpu.memory_space<vmem>>, vector<1x32xf32>
    %209 = arith.truncf %206 : vector<8x32xf32> to vector<8x32xbf16>
    %210 = tpu.iota {dimensions = array<i32: 1>} : vector<1x32xi32>
    %cst_91 = arith.constant 0.000000e+00 : f32
    %211 = vector.broadcast %cst_91 : f32 to vector<8x32xf32>
    %212 = vector.extract_strided_slice %204 {offsets = [0, 0], sizes = [8, 16], strides = [1, 1]} : vector<8x32xf32> to vector<8x16xf32>
    %213 = arith.truncf %212 : vector<8x16xf32> to vector<8x16xbf16>
    %214 = vector.extract_strided_slice %205 {offsets = [0, 0], sizes = [8, 16], strides = [1, 1]} : vector<8x32xf32> to vector<8x16xf32>
    %215 = arith.truncf %214 : vector<8x16xf32> to vector<8x16xbf16>
    %cst_92 = arith.constant dense<0.000000e+00> : vector<8x8xf32>
    %216 = tpu.matmul %213, %215, %cst_92 {dimension_numbers = #tpu.dot_dimension_numbers<[1], [1], [0], [0], [0, 0, 1, 0], [], []>} : vector<8x16xbf16>, vector<8x16xbf16>, vector<8x8xf32> -> vector<8x8xf32>
    %cst_93 = arith.constant 2.500000e-01 : f32
    %217 = vector.broadcast %cst_93 : f32 to vector<8x8xf32>
    %218 = arith.mulf %216, %217 : vector<8x8xf32>
    %219 = arith.addf %218, %197 : vector<8x8xf32>
    %cst_94 = arith.constant dense<0xFF800000> : vector<8xf32>
    %220 = vector.multi_reduction <maximumf>, %219, %cst_94 [1] : vector<8x8xf32> to vector<8xf32>
    %221 = vector.shape_cast %220 : vector<8xf32> to vector<8x1xf32>
    %222 = vector.broadcast %221 : vector<8x1xf32> to vector<8x8xf32>
    %223 = arith.subf %219, %222 : vector<8x8xf32>
    %224 = math.exp %223 : vector<8x8xf32>
    %cst_95 = arith.constant dense<0.000000e+00> : vector<8xf32>
    %225 = vector.multi_reduction <add>, %224, %cst_95 [1] : vector<8x8xf32> to vector<8xf32>
    %226 = vector.shape_cast %225 : vector<8xf32> to vector<8x1xf32>
    %227 = tpu.reciprocal %226 {approx = true} : vector<8x1xf32> -> vector<8x1xf32>
    %228 = vector.broadcast %227 : vector<8x1xf32> to vector<8x8xf32>
    %229 = arith.mulf %224, %228 : vector<8x8xf32>
    %230 = arith.truncf %229 : vector<8x8xf32> to vector<8x8xbf16>
    %cst_96 = arith.constant dense<0.000000e+00> : vector<8x32xf32>
    %231 = tpu.matmul %230, %209, %cst_96 {dimension_numbers = #tpu.dot_dimension_numbers<[1], [0], [0], [1], [0, 0, 1, 1], [], []>} : vector<8x8xbf16>, vector<8x32xbf16>, vector<8x32xf32> -> vector<8x32xf32>
    %c0_i32_97 = arith.constant 0 : i32
    %232 = vector.broadcast %c0_i32_97 : i32 to vector<1x32xi32>
    %233 = arith.cmpi sge, %210, %232 : vector<1x32xi32>
    %c16_i32_98 = arith.constant 16 : i32
    %234 = vector.broadcast %c16_i32_98 : i32 to vector<1x32xi32>
    %235 = arith.cmpi slt, %210, %234 : vector<1x32xi32>
    %236 = arith.andi %233, %235 : vector<1x32xi1>
    %cst_99 = arith.constant 0.000000e+00 : f32
    %237 = vector.shape_cast %236 : vector<1x32xi1> to vector<1x32xi1>
    %238 = vector.broadcast %237 : vector<1x32xi1> to vector<8x32xi1>
    %239 = vector.broadcast %cst_99 : f32 to vector<8x32xf32>
    %240 = arith.select %238, %231, %239 : vector<8x32xi1>, vector<8x32xf32>
    %241 = arith.addf %211, %240 : vector<8x32xf32>
    %242 = vector.extract_strided_slice %204 {offsets = [0, 16], sizes = [8, 16], strides = [1, 1]} : vector<8x32xf32> to vector<8x16xf32>
    %243 = arith.truncf %242 : vector<8x16xf32> to vector<8x16xbf16>
    %244 = vector.extract_strided_slice %205 {offsets = [0, 16], sizes = [8, 16], strides = [1, 1]} : vector<8x32xf32> to vector<8x16xf32>
    %245 = arith.truncf %244 : vector<8x16xf32> to vector<8x16xbf16>
    %cst_100 = arith.constant dense<0.000000e+00> : vector<8x8xf32>
    %246 = tpu.matmul %243, %245, %cst_100 {dimension_numbers = #tpu.dot_dimension_numbers<[1], [1], [0], [0], [0, 0, 1, 0], [], []>} : vector<8x16xbf16>, vector<8x16xbf16>, vector<8x8xf32> -> vector<8x8xf32>
    %cst_101 = arith.constant 2.500000e-01 : f32
    %247 = vector.broadcast %cst_101 : f32 to vector<8x8xf32>
    %248 = arith.mulf %246, %247 : vector<8x8xf32>
    %249 = arith.addf %248, %197 : vector<8x8xf32>
    %cst_102 = arith.constant dense<0xFF800000> : vector<8xf32>
    %250 = vector.multi_reduction <maximumf>, %249, %cst_102 [1] : vector<8x8xf32> to vector<8xf32>
    %251 = vector.shape_cast %250 : vector<8xf32> to vector<8x1xf32>
    %252 = vector.broadcast %251 : vector<8x1xf32> to vector<8x8xf32>
    %253 = arith.subf %249, %252 : vector<8x8xf32>
    %254 = math.exp %253 : vector<8x8xf32>
    %cst_103 = arith.constant dense<0.000000e+00> : vector<8xf32>
    %255 = vector.multi_reduction <add>, %254, %cst_103 [1] : vector<8x8xf32> to vector<8xf32>
    %256 = vector.shape_cast %255 : vector<8xf32> to vector<8x1xf32>
    %257 = tpu.reciprocal %256 {approx = true} : vector<8x1xf32> -> vector<8x1xf32>
    %258 = vector.broadcast %257 : vector<8x1xf32> to vector<8x8xf32>
    %259 = arith.mulf %254, %258 : vector<8x8xf32>
    %260 = arith.truncf %259 : vector<8x8xf32> to vector<8x8xbf16>
    %cst_104 = arith.constant dense<0.000000e+00> : vector<8x32xf32>
    %261 = tpu.matmul %260, %209, %cst_104 {dimension_numbers = #tpu.dot_dimension_numbers<[1], [0], [0], [1], [0, 0, 1, 1], [], []>} : vector<8x8xbf16>, vector<8x32xbf16>, vector<8x32xf32> -> vector<8x32xf32>
    %c16_i32_105 = arith.constant 16 : i32
    %262 = vector.broadcast %c16_i32_105 : i32 to vector<1x32xi32>
    %263 = arith.cmpi sge, %210, %262 : vector<1x32xi32>
    %c32_i32_106 = arith.constant 32 : i32
    %264 = vector.broadcast %c32_i32_106 : i32 to vector<1x32xi32>
    %265 = arith.cmpi slt, %210, %264 : vector<1x32xi32>
    %266 = arith.andi %263, %265 : vector<1x32xi1>
    %cst_107 = arith.constant 0.000000e+00 : f32
    %267 = vector.shape_cast %266 : vector<1x32xi1> to vector<1x32xi1>
    %268 = vector.broadcast %267 : vector<1x32xi1> to vector<8x32xi1>
    %269 = vector.broadcast %cst_107 : f32 to vector<8x32xf32>
    %270 = arith.select %268, %261, %269 : vector<8x32xi1>, vector<8x32xf32>
    %271 = arith.addf %241, %270 : vector<8x32xf32>
    %272 = arith.truncf %271 : vector<8x32xf32> to vector<8x32xbf16>
    %cst_108 = arith.constant dense<0.000000e+00> : vector<8x32xf32>
    %273 = tpu.matmul %272, %207, %cst_108 {dimension_numbers = #tpu.dot_dimension_numbers<[1], [0], [0], [1], [0, 0, 1, 1], [], []>} : vector<8x32xbf16>, vector<32x32xbf16>, vector<8x32xf32> -> vector<8x32xf32>
    %274 = vector.broadcast %208 : vector<1x32xf32> to vector<8x32xf32>
    %275 = arith.addf %273, %274 : vector<8x32xf32>
    %276 = arith.addf %20, %275 : vector<8x32xf32>
    %c0_109 = arith.constant 0 : index
    %c0_110 = arith.constant 0 : index
    %277 = vector.load %arg25[%c0_109, %c0_110] : memref<1x32xf32, #tpu.memory_space<vmem>>, vector<1x32xf32>
    %c0_111 = arith.constant 0 : index
    %c0_112 = arith.constant 0 : index
    %278 = vector.load %arg26[%c0_111, %c0_112] : memref<1x32xf32, #tpu.memory_space<vmem>>, vector<1x32xf32>
    %cst_113 = arith.constant dense<0.000000e+00> : vector<8xf32>
    %279 = vector.multi_reduction <add>, %276, %cst_113 [1] : vector<8x32xf32> to vector<8xf32>
    %280 = vector.shape_cast %279 : vector<8xf32> to vector<8x1xf32>
    %cst_114 = arith.constant 3.200000e+01 : f32
    %281 = vector.broadcast %cst_114 : f32 to vector<8x1xf32>
    %282 = arith.divf %280, %281 : vector<8x1xf32>
    %283 = vector.broadcast %282 : vector<8x1xf32> to vector<8x32xf32>
    %284 = arith.subf %276, %283 : vector<8x32xf32>
    %285 = arith.mulf %284, %284 : vector<8x32xf32>
    %cst_115 = arith.constant dense<0.000000e+00> : vector<8xf32>
    %286 = vector.multi_reduction <add>, %285, %cst_115 [1] : vector<8x32xf32> to vector<8xf32>
    %287 = vector.shape_cast %286 : vector<8xf32> to vector<8x1xf32>
    %cst_116 = arith.constant 3.200000e+01 : f32
    %288 = vector.broadcast %cst_116 : f32 to vector<8x1xf32>
    %289 = arith.divf %287, %288 : vector<8x1xf32>
    %290 = vector.broadcast %282 : vector<8x1xf32> to vector<8x32xf32>
    %291 = arith.subf %276, %290 : vector<8x32xf32>
    %cst_117 = arith.constant 9.99999974E-6 : f32
    %292 = vector.broadcast %cst_117 : f32 to vector<8x1xf32>
    %293 = arith.addf %289, %292 : vector<8x1xf32>
    %294 = math.rsqrt %293 : vector<8x1xf32>
    %295 = vector.broadcast %294 : vector<8x1xf32> to vector<8x32xf32>
    %296 = arith.mulf %291, %295 : vector<8x32xf32>
    %297 = vector.broadcast %277 : vector<1x32xf32> to vector<8x32xf32>
    %298 = arith.mulf %296, %297 : vector<8x32xf32>
    %299 = vector.broadcast %278 : vector<1x32xf32> to vector<8x32xf32>
    %300 = arith.addf %298, %299 : vector<8x32xf32>
    %301 = arith.truncf %300 : vector<8x32xf32> to vector<8x32xbf16>
    %c0_118 = arith.constant 0 : index
    %c0_119 = arith.constant 0 : index
    %302 = vector.load %arg27[%c0_118, %c0_119] : memref<32x32xbf16, #tpu.memory_space<vmem>>, vector<32x32xbf16>
    %cst_120 = arith.constant dense<0.000000e+00> : vector<8x32xf32>
    %303 = tpu.matmul %301, %302, %cst_120 {dimension_numbers = #tpu.dot_dimension_numbers<[1], [0], [0], [1], [0, 0, 1, 1], [], []>} : vector<8x32xbf16>, vector<32x32xbf16>, vector<8x32xf32> -> vector<8x32xf32>
    %c0_121 = arith.constant 0 : index
    %c0_122 = arith.constant 0 : index
    %304 = vector.load %arg28[%c0_121, %c0_122] : memref<1x32xf32, #tpu.memory_space<vmem>>, vector<1x32xf32>
    %305 = vector.broadcast %304 : vector<1x32xf32> to vector<8x32xf32>
    %306 = arith.addf %303, %305 : vector<8x32xf32>
    %307 = arith.truncf %189 : vector<8x32xf32> to vector<8x32xbf16>
    %c0_123 = arith.constant 0 : index
    %c0_124 = arith.constant 0 : index
    %308 = vector.load %arg29[%c0_123, %c0_124] : memref<32x64xbf16, #tpu.memory_space<vmem>>, vector<32x64xbf16>
    %cst_125 = arith.constant dense<0.000000e+00> : vector<8x64xf32>
    %309 = tpu.matmul %307, %308, %cst_125 {dimension_numbers = #tpu.dot_dimension_numbers<[1], [0], [0], [1], [0, 0, 1, 1], [], []>} : vector<8x32xbf16>, vector<32x64xbf16>, vector<8x64xf32> -> vector<8x64xf32>
    %c0_126 = arith.constant 0 : index
    %c0_127 = arith.constant 0 : index
    %310 = vector.load %arg30[%c0_126, %c0_127] : memref<1x64xf32, #tpu.memory_space<vmem>>, vector<1x64xf32>
    %311 = vector.broadcast %310 : vector<1x64xf32> to vector<8x64xf32>
    %312 = arith.addf %309, %311 : vector<8x64xf32>
    %313 = vector.extract_strided_slice %312 {offsets = [0, 0], sizes = [8, 32], strides = [1, 1]} : vector<8x64xf32> to vector<8x32xf32>
    %314 = vector.extract_strided_slice %312 {offsets = [0, 32], sizes = [8, 32], strides = [1, 1]} : vector<8x64xf32> to vector<8x32xf32>
    %c0_128 = arith.constant 0 : index
    %c0_129 = arith.constant 0 : index
    %315 = vector.load %arg31[%c0_128, %c0_129] : memref<32x32xbf16, #tpu.memory_space<vmem>>, vector<32x32xbf16>
    %c0_130 = arith.constant 0 : index
    %c0_131 = arith.constant 0 : index
    %316 = vector.load %arg32[%c0_130, %c0_131] : memref<1x32xf32, #tpu.memory_space<vmem>>, vector<1x32xf32>
    %317 = arith.truncf %314 : vector<8x32xf32> to vector<8x32xbf16>
    %318 = tpu.iota {dimensions = array<i32: 1>} : vector<1x32xi32>
    %cst_132 = arith.constant 0.000000e+00 : f32
    %319 = vector.broadcast %cst_132 : f32 to vector<8x32xf32>
    %320 = vector.extract_strided_slice %306 {offsets = [0, 0], sizes = [8, 16], strides = [1, 1]} : vector<8x32xf32> to vector<8x16xf32>
    %321 = arith.truncf %320 : vector<8x16xf32> to vector<8x16xbf16>
    %322 = vector.extract_strided_slice %313 {offsets = [0, 0], sizes = [8, 16], strides = [1, 1]} : vector<8x32xf32> to vector<8x16xf32>
    %323 = arith.truncf %322 : vector<8x16xf32> to vector<8x16xbf16>
    %cst_133 = arith.constant dense<0.000000e+00> : vector<8x8xf32>
    %324 = tpu.matmul %321, %323, %cst_133 {dimension_numbers = #tpu.dot_dimension_numbers<[1], [1], [0], [0], [0, 0, 1, 0], [], []>} : vector<8x16xbf16>, vector<8x16xbf16>, vector<8x8xf32> -> vector<8x8xf32>
    %cst_134 = arith.constant 2.500000e-01 : f32
    %325 = vector.broadcast %cst_134 : f32 to vector<8x8xf32>
    %326 = arith.mulf %324, %325 : vector<8x8xf32>
    %327 = vector.broadcast %27 : vector<1x8xf32> to vector<8x8xf32>
    %328 = arith.addf %326, %327 : vector<8x8xf32>
    %cst_135 = arith.constant dense<0xFF800000> : vector<8xf32>
    %329 = vector.multi_reduction <maximumf>, %328, %cst_135 [1] : vector<8x8xf32> to vector<8xf32>
    %330 = vector.shape_cast %329 : vector<8xf32> to vector<8x1xf32>
    %331 = vector.broadcast %330 : vector<8x1xf32> to vector<8x8xf32>
    %332 = arith.subf %328, %331 : vector<8x8xf32>
    %333 = math.exp %332 : vector<8x8xf32>
    %cst_136 = arith.constant dense<0.000000e+00> : vector<8xf32>
    %334 = vector.multi_reduction <add>, %333, %cst_136 [1] : vector<8x8xf32> to vector<8xf32>
    %335 = vector.shape_cast %334 : vector<8xf32> to vector<8x1xf32>
    %336 = tpu.reciprocal %335 {approx = true} : vector<8x1xf32> -> vector<8x1xf32>
    %337 = vector.broadcast %336 : vector<8x1xf32> to vector<8x8xf32>
    %338 = arith.mulf %333, %337 : vector<8x8xf32>
    %339 = arith.truncf %338 : vector<8x8xf32> to vector<8x8xbf16>
    %cst_137 = arith.constant dense<0.000000e+00> : vector<8x32xf32>
    %340 = tpu.matmul %339, %317, %cst_137 {dimension_numbers = #tpu.dot_dimension_numbers<[1], [0], [0], [1], [0, 0, 1, 1], [], []>} : vector<8x8xbf16>, vector<8x32xbf16>, vector<8x32xf32> -> vector<8x32xf32>
    %c0_i32_138 = arith.constant 0 : i32
    %341 = vector.broadcast %c0_i32_138 : i32 to vector<1x32xi32>
    %342 = arith.cmpi sge, %318, %341 : vector<1x32xi32>
    %c16_i32_139 = arith.constant 16 : i32
    %343 = vector.broadcast %c16_i32_139 : i32 to vector<1x32xi32>
    %344 = arith.cmpi slt, %318, %343 : vector<1x32xi32>
    %345 = arith.andi %342, %344 : vector<1x32xi1>
    %cst_140 = arith.constant 0.000000e+00 : f32
    %346 = vector.shape_cast %345 : vector<1x32xi1> to vector<1x32xi1>
    %347 = vector.broadcast %346 : vector<1x32xi1> to vector<8x32xi1>
    %348 = vector.broadcast %cst_140 : f32 to vector<8x32xf32>
    %349 = arith.select %347, %340, %348 : vector<8x32xi1>, vector<8x32xf32>
    %350 = arith.addf %319, %349 : vector<8x32xf32>
    %351 = vector.extract_strided_slice %306 {offsets = [0, 16], sizes = [8, 16], strides = [1, 1]} : vector<8x32xf32> to vector<8x16xf32>
    %352 = arith.truncf %351 : vector<8x16xf32> to vector<8x16xbf16>
    %353 = vector.extract_strided_slice %313 {offsets = [0, 16], sizes = [8, 16], strides = [1, 1]} : vector<8x32xf32> to vector<8x16xf32>
    %354 = arith.truncf %353 : vector<8x16xf32> to vector<8x16xbf16>
    %cst_141 = arith.constant dense<0.000000e+00> : vector<8x8xf32>
    %355 = tpu.matmul %352, %354, %cst_141 {dimension_numbers = #tpu.dot_dimension_numbers<[1], [1], [0], [0], [0, 0, 1, 0], [], []>} : vector<8x16xbf16>, vector<8x16xbf16>, vector<8x8xf32> -> vector<8x8xf32>
    %cst_142 = arith.constant 2.500000e-01 : f32
    %356 = vector.broadcast %cst_142 : f32 to vector<8x8xf32>
    %357 = arith.mulf %355, %356 : vector<8x8xf32>
    %358 = vector.broadcast %27 : vector<1x8xf32> to vector<8x8xf32>
    %359 = arith.addf %357, %358 : vector<8x8xf32>
    %cst_143 = arith.constant dense<0xFF800000> : vector<8xf32>
    %360 = vector.multi_reduction <maximumf>, %359, %cst_143 [1] : vector<8x8xf32> to vector<8xf32>
    %361 = vector.shape_cast %360 : vector<8xf32> to vector<8x1xf32>
    %362 = vector.broadcast %361 : vector<8x1xf32> to vector<8x8xf32>
    %363 = arith.subf %359, %362 : vector<8x8xf32>
    %364 = math.exp %363 : vector<8x8xf32>
    %cst_144 = arith.constant dense<0.000000e+00> : vector<8xf32>
    %365 = vector.multi_reduction <add>, %364, %cst_144 [1] : vector<8x8xf32> to vector<8xf32>
    %366 = vector.shape_cast %365 : vector<8xf32> to vector<8x1xf32>
    %367 = tpu.reciprocal %366 {approx = true} : vector<8x1xf32> -> vector<8x1xf32>
    %368 = vector.broadcast %367 : vector<8x1xf32> to vector<8x8xf32>
    %369 = arith.mulf %364, %368 : vector<8x8xf32>
    %370 = arith.truncf %369 : vector<8x8xf32> to vector<8x8xbf16>
    %cst_145 = arith.constant dense<0.000000e+00> : vector<8x32xf32>
    %371 = tpu.matmul %370, %317, %cst_145 {dimension_numbers = #tpu.dot_dimension_numbers<[1], [0], [0], [1], [0, 0, 1, 1], [], []>} : vector<8x8xbf16>, vector<8x32xbf16>, vector<8x32xf32> -> vector<8x32xf32>
    %c16_i32_146 = arith.constant 16 : i32
    %372 = vector.broadcast %c16_i32_146 : i32 to vector<1x32xi32>
    %373 = arith.cmpi sge, %318, %372 : vector<1x32xi32>
    %c32_i32_147 = arith.constant 32 : i32
    %374 = vector.broadcast %c32_i32_147 : i32 to vector<1x32xi32>
    %375 = arith.cmpi slt, %318, %374 : vector<1x32xi32>
    %376 = arith.andi %373, %375 : vector<1x32xi1>
    %cst_148 = arith.constant 0.000000e+00 : f32
    %377 = vector.shape_cast %376 : vector<1x32xi1> to vector<1x32xi1>
    %378 = vector.broadcast %377 : vector<1x32xi1> to vector<8x32xi1>
    %379 = vector.broadcast %cst_148 : f32 to vector<8x32xf32>
    %380 = arith.select %378, %371, %379 : vector<8x32xi1>, vector<8x32xf32>
    %381 = arith.addf %350, %380 : vector<8x32xf32>
    %382 = arith.truncf %381 : vector<8x32xf32> to vector<8x32xbf16>
    %cst_149 = arith.constant dense<0.000000e+00> : vector<8x32xf32>
    %383 = tpu.matmul %382, %315, %cst_149 {dimension_numbers = #tpu.dot_dimension_numbers<[1], [0], [0], [1], [0, 0, 1, 1], [], []>} : vector<8x32xbf16>, vector<32x32xbf16>, vector<8x32xf32> -> vector<8x32xf32>
    %384 = vector.broadcast %316 : vector<1x32xf32> to vector<8x32xf32>
    %385 = arith.addf %383, %384 : vector<8x32xf32>
    %386 = arith.addf %300, %385 : vector<8x32xf32>
    %c0_150 = arith.constant 0 : index
    %c0_151 = arith.constant 0 : index
    %387 = vector.load %arg33[%c0_150, %c0_151] : memref<1x32xf32, #tpu.memory_space<vmem>>, vector<1x32xf32>
    %c0_152 = arith.constant 0 : index
    %c0_153 = arith.constant 0 : index
    %388 = vector.load %arg34[%c0_152, %c0_153] : memref<1x32xf32, #tpu.memory_space<vmem>>, vector<1x32xf32>
    %cst_154 = arith.constant dense<0.000000e+00> : vector<8xf32>
    %389 = vector.multi_reduction <add>, %386, %cst_154 [1] : vector<8x32xf32> to vector<8xf32>
    %390 = vector.shape_cast %389 : vector<8xf32> to vector<8x1xf32>
    %cst_155 = arith.constant 3.200000e+01 : f32
    %391 = vector.broadcast %cst_155 : f32 to vector<8x1xf32>
    %392 = arith.divf %390, %391 : vector<8x1xf32>
    %393 = vector.broadcast %392 : vector<8x1xf32> to vector<8x32xf32>
    %394 = arith.subf %386, %393 : vector<8x32xf32>
    %395 = arith.mulf %394, %394 : vector<8x32xf32>
    %cst_156 = arith.constant dense<0.000000e+00> : vector<8xf32>
    %396 = vector.multi_reduction <add>, %395, %cst_156 [1] : vector<8x32xf32> to vector<8xf32>
    %397 = vector.shape_cast %396 : vector<8xf32> to vector<8x1xf32>
    %cst_157 = arith.constant 3.200000e+01 : f32
    %398 = vector.broadcast %cst_157 : f32 to vector<8x1xf32>
    %399 = arith.divf %397, %398 : vector<8x1xf32>
    %400 = vector.broadcast %392 : vector<8x1xf32> to vector<8x32xf32>
    %401 = arith.subf %386, %400 : vector<8x32xf32>
    %cst_158 = arith.constant 9.99999974E-6 : f32
    %402 = vector.broadcast %cst_158 : f32 to vector<8x1xf32>
    %403 = arith.addf %399, %402 : vector<8x1xf32>
    %404 = math.rsqrt %403 : vector<8x1xf32>
    %405 = vector.broadcast %404 : vector<8x1xf32> to vector<8x32xf32>
    %406 = arith.mulf %401, %405 : vector<8x32xf32>
    %407 = vector.broadcast %387 : vector<1x32xf32> to vector<8x32xf32>
    %408 = arith.mulf %406, %407 : vector<8x32xf32>
    %409 = vector.broadcast %388 : vector<1x32xf32> to vector<8x32xf32>
    %410 = arith.addf %408, %409 : vector<8x32xf32>
    %c0_159 = arith.constant 0 : index
    %c0_160 = arith.constant 0 : index
    %411 = vector.load %arg35[%c0_159, %c0_160] : memref<32x64xbf16, #tpu.memory_space<vmem>>, vector<32x64xbf16>
    %c0_161 = arith.constant 0 : index
    %c0_162 = arith.constant 0 : index
    %412 = vector.load %arg36[%c0_161, %c0_162] : memref<1x64xf32, #tpu.memory_space<vmem>>, vector<1x64xf32>
    %c0_163 = arith.constant 0 : index
    %c0_164 = arith.constant 0 : index
    %413 = vector.load %arg37[%c0_163, %c0_164] : memref<64x32xbf16, #tpu.memory_space<vmem>>, vector<64x32xbf16>
    %c0_165 = arith.constant 0 : index
    %c0_166 = arith.constant 0 : index
    %414 = vector.load %arg38[%c0_165, %c0_166] : memref<1x32xf32, #tpu.memory_space<vmem>>, vector<1x32xf32>
    %415 = arith.truncf %410 : vector<8x32xf32> to vector<8x32xbf16>
    %cst_167 = arith.constant dense<0.000000e+00> : vector<8x64xf32>
    %416 = tpu.matmul %415, %411, %cst_167 {dimension_numbers = #tpu.dot_dimension_numbers<[1], [0], [0], [1], [0, 0, 1, 1], [], []>} : vector<8x32xbf16>, vector<32x64xbf16>, vector<8x64xf32> -> vector<8x64xf32>
    %417 = vector.broadcast %412 : vector<1x64xf32> to vector<8x64xf32>
    %418 = arith.addf %416, %417 : vector<8x64xf32>
    %419 = arith.mulf %418, %418 : vector<8x64xf32>
    %420 = arith.mulf %418, %419 : vector<8x64xf32>
    %cst_168 = arith.constant 4.471500e-02 : f32
    %421 = vector.broadcast %cst_168 : f32 to vector<8x64xf32>
    %422 = arith.mulf %421, %420 : vector<8x64xf32>
    %423 = arith.addf %418, %422 : vector<8x64xf32>
    %cst_169 = arith.constant 0.797884583 : f32
    %424 = vector.broadcast %cst_169 : f32 to vector<8x64xf32>
    %425 = arith.mulf %424, %423 : vector<8x64xf32>
    %426 = math.tanh %425 : vector<8x64xf32>
    %cst_170 = arith.constant 1.000000e+00 : f32
    %427 = vector.broadcast %cst_170 : f32 to vector<8x64xf32>
    %428 = arith.addf %427, %426 : vector<8x64xf32>
    %cst_171 = arith.constant 5.000000e-01 : f32
    %429 = vector.broadcast %cst_171 : f32 to vector<8x64xf32>
    %430 = arith.mulf %429, %428 : vector<8x64xf32>
    %431 = arith.mulf %418, %430 : vector<8x64xf32>
    %432 = arith.truncf %431 : vector<8x64xf32> to vector<8x64xbf16>
    %cst_172 = arith.constant dense<0.000000e+00> : vector<8x32xf32>
    %433 = tpu.matmul %432, %413, %cst_172 {dimension_numbers = #tpu.dot_dimension_numbers<[1], [0], [0], [1], [0, 0, 1, 1], [], []>} : vector<8x64xbf16>, vector<64x32xbf16>, vector<8x32xf32> -> vector<8x32xf32>
    %434 = vector.broadcast %414 : vector<1x32xf32> to vector<8x32xf32>
    %435 = arith.addf %433, %434 : vector<8x32xf32>
    %436 = arith.addf %410, %435 : vector<8x32xf32>
    %c0_173 = arith.constant 0 : index
    %c0_174 = arith.constant 0 : index
    %437 = vector.load %arg39[%c0_173, %c0_174] : memref<1x32xf32, #tpu.memory_space<vmem>>, vector<1x32xf32>
    %c0_175 = arith.constant 0 : index
    %c0_176 = arith.constant 0 : index
    %438 = vector.load %arg40[%c0_175, %c0_176] : memref<1x32xf32, #tpu.memory_space<vmem>>, vector<1x32xf32>
    %cst_177 = arith.constant dense<0.000000e+00> : vector<8xf32>
    %439 = vector.multi_reduction <add>, %436, %cst_177 [1] : vector<8x32xf32> to vector<8xf32>
    %440 = vector.shape_cast %439 : vector<8xf32> to vector<8x1xf32>
    %cst_178 = arith.constant 3.200000e+01 : f32
    %441 = vector.broadcast %cst_178 : f32 to vector<8x1xf32>
    %442 = arith.divf %440, %441 : vector<8x1xf32>
    %443 = vector.broadcast %442 : vector<8x1xf32> to vector<8x32xf32>
    %444 = arith.subf %436, %443 : vector<8x32xf32>
    %445 = arith.mulf %444, %444 : vector<8x32xf32>
    %cst_179 = arith.constant dense<0.000000e+00> : vector<8xf32>
    %446 = vector.multi_reduction <add>, %445, %cst_179 [1] : vector<8x32xf32> to vector<8xf32>
    %447 = vector.shape_cast %446 : vector<8xf32> to vector<8x1xf32>
    %cst_180 = arith.constant 3.200000e+01 : f32
    %448 = vector.broadcast %cst_180 : f32 to vector<8x1xf32>
    %449 = arith.divf %447, %448 : vector<8x1xf32>
    %450 = vector.broadcast %442 : vector<8x1xf32> to vector<8x32xf32>
    %451 = arith.subf %436, %450 : vector<8x32xf32>
    %cst_181 = arith.constant 9.99999974E-6 : f32
    %452 = vector.broadcast %cst_181 : f32 to vector<8x1xf32>
    %453 = arith.addf %449, %452 : vector<8x1xf32>
    %454 = math.rsqrt %453 : vector<8x1xf32>
    %455 = vector.broadcast %454 : vector<8x1xf32> to vector<8x32xf32>
    %456 = arith.mulf %451, %455 : vector<8x32xf32>
    %457 = vector.broadcast %437 : vector<1x32xf32> to vector<8x32xf32>
    %458 = arith.mulf %456, %457 : vector<8x32xf32>
    %459 = vector.broadcast %438 : vector<1x32xf32> to vector<8x32xf32>
    %460 = arith.addf %458, %459 : vector<8x32xf32>
    %461 = arith.truncf %460 : vector<8x32xf32> to vector<8x32xbf16>
    %462 = arith.truncf %0 : vector<128x32xf32> to vector<128x32xbf16>
    %cst_182 = arith.constant dense<0.000000e+00> : vector<8x128xf32>
    %463 = tpu.matmul %461, %462, %cst_182 {dimension_numbers = #tpu.dot_dimension_numbers<[1], [1], [0], [0], [0, 0, 1, 0], [], []>} : vector<8x32xbf16>, vector<128x32xbf16>, vector<8x128xf32> -> vector<8x128xf32>
    %c0_183 = arith.constant 0 : index
    %c0_184 = arith.constant 0 : index
    %464 = vector.load %arg41[%c0_183, %c0_184] : memref<1x128xf32, #tpu.memory_space<vmem>>, vector<1x128xf32>
    %465 = vector.broadcast %464 : vector<1x128xf32> to vector<8x128xf32>
    %466 = arith.addf %463, %465 : vector<8x128xf32>
    %c0_185 = arith.constant 0 : index
    %c0_186 = arith.constant 0 : index
    %c0_187 = arith.constant 0 : index
    %467 = vector.load %arg5[%c0_185, %c0_186, %c0_187] : memref<1x8x1xi32, #tpu.memory_space<vmem>>, vector<1x8x1xi32>
    %468 = vector.shape_cast %467 : vector<1x8x1xi32> to vector<8x1xi32>
    %c0_i32_188 = arith.constant 0 : i32
    %469 = vector.broadcast %c0_i32_188 : i32 to vector<8x1xi32>
    %470 = arith.cmpi sge, %468, %469 : vector<8x1xi32>
    %471 = arith.extui %470 : vector<8x1xi1> to vector<8x1xi32>
    %472 = arith.sitofp %471 : vector<8x1xi32> to vector<8x1xf32>
    %473 = vector.broadcast %468 : vector<8x1xi32> to vector<8x128xi32>
    %474 = arith.cmpi eq, %11, %473 : vector<8x128xi32>
    %cst_189 = arith.constant 0.000000e+00 : f32
    %475 = vector.broadcast %cst_189 : f32 to vector<8x128xf32>
    %476 = arith.select %474, %466, %475 : vector<8x128xi1>, vector<8x128xf32>
    %cst_190 = arith.constant dense<0.000000e+00> : vector<8xf32>
    %477 = vector.multi_reduction <add>, %476, %cst_190 [1] : vector<8x128xf32> to vector<8xf32>
    %478 = vector.shape_cast %477 : vector<8xf32> to vector<8x1xf32>
    %cst_191 = arith.constant dense<0xFF800000> : vector<8xf32>
    %479 = vector.multi_reduction <maximumf>, %466, %cst_191 [1] : vector<8x128xf32> to vector<8xf32>
    %480 = vector.shape_cast %479 : vector<8xf32> to vector<8x1xf32>
    %481 = vector.broadcast %480 : vector<8x1xf32> to vector<8x128xf32>
    %482 = arith.subf %466, %481 : vector<8x128xf32>
    %483 = math.exp %482 : vector<8x128xf32>
    %cst_192 = arith.constant dense<0.000000e+00> : vector<8xf32>
    %484 = vector.multi_reduction <add>, %483, %cst_192 [1] : vector<8x128xf32> to vector<8xf32>
    %485 = vector.shape_cast %484 : vector<8xf32> to vector<8x1xf32>
    %486 = math.log %485 : vector<8x1xf32>
    %487 = arith.addf %480, %486 : vector<8x1xf32>
    %488 = arith.subf %487, %478 : vector<8x1xf32>
    %489 = arith.mulf %488, %472 : vector<8x1xf32>
    %cst_193 = arith.constant dense<0.000000e+00> : vector<1xf32>
    %490 = vector.multi_reduction <add>, %489, %cst_193 [0] : vector<8x1xf32> to vector<1xf32>
    %491 = vector.shape_cast %490 : vector<1xf32> to vector<1x1xf32>
    %cst_194 = arith.constant dense<0.000000e+00> : vector<1xf32>
    %492 = vector.multi_reduction <add>, %472, %cst_194 [0] : vector<8x1xf32> to vector<1xf32>
    %493 = vector.shape_cast %492 : vector<1xf32> to vector<1x1xf32>
    %494 = tpu.iota {dimensions = array<i32: 1>} : vector<1x128xi32>
    %c0_i32_195 = arith.constant 0 : i32
    %495 = vector.broadcast %c0_i32_195 : i32 to vector<1x128xi32>
    %496 = arith.cmpi eq, %494, %495 : vector<1x128xi32>
    %c1_i32 = arith.constant 1 : i32
    %497 = vector.broadcast %c1_i32 : i32 to vector<1x128xi32>
    %498 = arith.cmpi eq, %494, %497 : vector<1x128xi32>
    %cst_196 = arith.constant 0.000000e+00 : f32
    %499 = vector.shape_cast %493 : vector<1x1xf32> to vector<1x1xf32>
    %500 = vector.broadcast %499 : vector<1x1xf32> to vector<1x128xf32>
    %501 = vector.broadcast %cst_196 : f32 to vector<1x128xf32>
    %502 = arith.select %498, %500, %501 : vector<1x128xi1>, vector<1x128xf32>
    %503 = vector.shape_cast %491 : vector<1x1xf32> to vector<1x1xf32>
    %504 = vector.broadcast %503 : vector<1x1xf32> to vector<1x128xf32>
    %505 = arith.select %496, %504, %502 : vector<1x128xi1>, vector<1x128xf32>
    %c0_197 = arith.constant 0 : index
    %c0_198 = arith.constant 0 : index
    %c0_199 = arith.constant 0 : index
    %506 = vector.load %arg42[%c0_197, %c0_198, %c0_199] : memref<1x1x128xf32, #tpu.memory_space<vmem>>, vector<1x1x128xf32>
    %507 = vector.shape_cast %506 : vector<1x1x128xf32> to vector<1x128xf32>
    %508 = vector.shape_cast %505 : vector<1x128xf32> to vector<1x1x128xf32>
    tpu.vector_store %arg42[%c0_197, %c0_198, %c0_199], %508 {strides = array<i32>} : memref<1x1x128xf32, #tpu.memory_space<vmem>>, vector<1x1x128xf32>,
    return
  }
  func.func @transform_0(%arg0: i32) -> (i32, i32, i32) {
    %c0_i32 = arith.constant 0 : i32
    %c0_i32_0 = arith.constant 0 : i32
    %c0_i32_1 = arith.constant 0 : i32
    return %arg0, %c0_i32, %c0_i32_0 : i32, i32, i32
  }
  func.func @transform_1(%arg0: i32) -> (i32, i32, i32) {
    %c0_i32 = arith.constant 0 : i32
    %c0_i32_0 = arith.constant 0 : i32
    %c0_i32_1 = arith.constant 0 : i32
    return %arg0, %c0_i32, %c0_i32_0 : i32, i32, i32
  }
  func.func @transform_2(%arg0: i32) -> (i32, i32, i32) {
    %c0_i32 = arith.constant 0 : i32
    %c0_i32_0 = arith.constant 0 : i32
    %c0_i32_1 = arith.constant 0 : i32
    return %arg0, %c0_i32, %c0_i32_0 : i32, i32, i32
  }
  func.func @transform_3(%arg0: i32) -> (i32, i32, i32) {
    %c0_i32 = arith.constant 0 : i32
    %c0_i32_0 = arith.constant 0 : i32
    %c0_i32_1 = arith.constant 0 : i32
    return %arg0, %c0_i32, %c0_i32_0 : i32, i32, i32
  }
  func.func @transform_4(%arg0: i32) -> (i32, i32, i32) {
    %c0_i32 = arith.constant 0 : i32
    %c0_i32_0 = arith.constant 0 : i32
    %c0_i32_1 = arith.constant 0 : i32
    return %arg0, %c0_i32, %c0_i32_0 : i32, i32, i32
  }
  func.func @transform_5(%arg0: i32) -> (i32, i32) {
    %c0_i32 = arith.constant 0 : i32
    %c0_i32_0 = arith.constant 0 : i32
    %c0_i32_1 = arith.constant 0 : i32
    return %c0_i32, %c0_i32_0 : i32, i32
  }
  func.func @transform_6(%arg0: i32) -> (i32, i32) {
    %c0_i32 = arith.constant 0 : i32
    %c0_i32_0 = arith.constant 0 : i32
    %c0_i32_1 = arith.constant 0 : i32
    return %c0_i32, %c0_i32_0 : i32, i32
  }
  func.func @transform_7(%arg0: i32) -> (i32, i32) {
    %c0_i32 = arith.constant 0 : i32
    %c0_i32_0 = arith.constant 0 : i32
    %c0_i32_1 = arith.constant 0 : i32
    return %c0_i32, %c0_i32_0 : i32, i32
  }
  func.func @transform_8(%arg0: i32) -> (i32, i32) {
    %c0_i32 = arith.constant 0 : i32
    %c0_i32_0 = arith.constant 0 : i32
    %c0_i32_1 = arith.constant 0 : i32
    return %c0_i32, %c0_i32_0 : i32, i32
  }
  func.func @transform_9(%arg0: i32) -> (i32, i32) {
    %c0_i32 = arith.constant 0 : i32
    %c0_i32_0 = arith.constant 0 : i32
    %c0_i32_1 = arith.constant 0 : i32
    return %c0_i32, %c0_i32_0 : i32, i32
  }
  func.func @transform_10(%arg0: i32) -> (i32, i32) {
    %c0_i32 = arith.constant 0 : i32
    %c0_i32_0 = arith.constant 0 : i32
    %c0_i32_1 = arith.constant 0 : i32
    return %c0_i32, %c0_i32_0 : i32, i32
  }
  func.func @transform_11(%arg0: i32) -> (i32, i32) {
    %c0_i32 = arith.constant 0 : i32
    %c0_i32_0 = arith.constant 0 : i32
    %c0_i32_1 = arith.constant 0 : i32
    return %c0_i32, %c0_i32_0 : i32, i32
  }
  func.func @transform_12(%arg0: i32) -> (i32, i32) {
    %c0_i32 = arith.constant 0 : i32
    %c0_i32_0 = arith.constant 0 : i32
    %c0_i32_1 = arith.constant 0 : i32
    return %c0_i32, %c0_i32_0 : i32, i32
  }
  func.func @transform_13(%arg0: i32) -> (i32, i32) {
    %c0_i32 = arith.constant 0 : i32
    %c0_i32_0 = arith.constant 0 : i32
    %c0_i32_1 = arith.constant 0 : i32
    return %c0_i32, %c0_i32_0 : i32, i32
  }
  func.func @transform_14(%arg0: i32) -> (i32, i32) {
    %c0_i32 = arith.constant 0 : i32
    %c0_i32_0 = arith.constant 0 : i32
    %c0_i32_1 = arith.constant 0 : i32
    return %c0_i32, %c0_i32_0 : i32, i32
  }
  func.func @transform_15(%arg0: i32) -> (i32, i32) {
    %c0_i32 = arith.constant 0 : i32
    %c0_i32_0 = arith.constant 0 : i32
    %c0_i32_1 = arith.constant 0 : i32
    return %c0_i32, %c0_i32_0 : i32, i32
  }
  func.func @transform_16(%arg0: i32) -> (i32, i32) {
    %c0_i32 = arith.constant 0 : i32
    %c0_i32_0 = arith.constant 0 : i32
    %c0_i32_1 = arith.constant 0 : i32
    return %c0_i32, %c0_i32_0 : i32, i32
  }
  func.func @transform_17(%arg0: i32) -> (i32, i32) {
    %c0_i32 = arith.constant 0 : i32
    %c0_i32_0 = arith.constant 0 : i32
    %c0_i32_1 = arith.constant 0 : i32
    return %c0_i32, %c0_i32_0 : i32, i32
  }
  func.func @transform_18(%arg0: i32) -> (i32, i32) {
    %c0_i32 = arith.constant 0 : i32
    %c0_i32_0 = arith.constant 0 : i32
    %c0_i32_1 = arith.constant 0 : i32
    return %c0_i32, %c0_i32_0 : i32, i32
  }
  func.func @transform_19(%arg0: i32) -> (i32, i32) {
    %c0_i32 = arith.constant 0 : i32
    %c0_i32_0 = arith.constant 0 : i32
    %c0_i32_1 = arith.constant 0 : i32
    return %c0_i32, %c0_i32_0 : i32, i32
  }
  func.func @transform_20(%arg0: i32) -> (i32, i32) {
    %c0_i32 = arith.constant 0 : i32
    %c0_i32_0 = arith.constant 0 : i32
    %c0_i32_1 = arith.constant 0 : i32
    return %c0_i32, %c0_i32_0 : i32, i32
  }
  func.func @transform_21(%arg0: i32) -> (i32, i32) {
    %c0_i32 = arith.constant 0 : i32
    %c0_i32_0 = arith.constant 0 : i32
    %c0_i32_1 = arith.constant 0 : i32
    return %c0_i32, %c0_i32_0 : i32, i32
  }
  func.func @transform_22(%arg0: i32) -> (i32, i32) {
    %c0_i32 = arith.constant 0 : i32
    %c0_i32_0 = arith.constant 0 : i32
    %c0_i32_1 = arith.constant 0 : i32
    return %c0_i32, %c0_i32_0 : i32, i32
  }
  func.func @transform_23(%arg0: i32) -> (i32, i32) {
    %c0_i32 = arith.constant 0 : i32
    %c0_i32_0 = arith.constant 0 : i32
    %c0_i32_1 = arith.constant 0 : i32
    return %c0_i32, %c0_i32_0 : i32, i32
  }
  func.func @transform_24(%arg0: i32) -> (i32, i32) {
    %c0_i32 = arith.constant 0 : i32
    %c0_i32_0 = arith.constant 0 : i32
    %c0_i32_1 = arith.constant 0 : i32
    return %c0_i32, %c0_i32_0 : i32, i32
  }
  func.func @transform_25(%arg0: i32) -> (i32, i32) {
    %c0_i32 = arith.constant 0 : i32
    %c0_i32_0 = arith.constant 0 : i32
    %c0_i32_1 = arith.constant 0 : i32
    return %c0_i32, %c0_i32_0 : i32, i32
  }
  func.func @transform_26(%arg0: i32) -> (i32, i32) {
    %c0_i32 = arith.constant 0 : i32
    %c0_i32_0 = arith.constant 0 : i32
    %c0_i32_1 = arith.constant 0 : i32
    return %c0_i32, %c0_i32_0 : i32, i32
  }
  func.func @transform_27(%arg0: i32) -> (i32, i32) {
    %c0_i32 = arith.constant 0 : i32
    %c0_i32_0 = arith.constant 0 : i32
    %c0_i32_1 = arith.constant 0 : i32
    return %c0_i32, %c0_i32_0 : i32, i32
  }
  func.func @transform_28(%arg0: i32) -> (i32, i32) {
    %c0_i32 = arith.constant 0 : i32
    %c0_i32_0 = arith.constant 0 : i32
    %c0_i32_1 = arith.constant 0 : i32
    return %c0_i32, %c0_i32_0 : i32, i32
  }
  func.func @transform_29(%arg0: i32) -> (i32, i32) {
    %c0_i32 = arith.constant 0 : i32
    %c0_i32_0 = arith.constant 0 : i32
    %c0_i32_1 = arith.constant 0 : i32
    return %c0_i32, %c0_i32_0 : i32, i32
  }
  func.func @transform_30(%arg0: i32) -> (i32, i32) {
    %c0_i32 = arith.constant 0 : i32
    %c0_i32_0 = arith.constant 0 : i32
    %c0_i32_1 = arith.constant 0 : i32
    return %c0_i32, %c0_i32_0 : i32, i32
  }
  func.func @transform_31(%arg0: i32) -> (i32, i32) {
    %c0_i32 = arith.constant 0 : i32
    %c0_i32_0 = arith.constant 0 : i32
    %c0_i32_1 = arith.constant 0 : i32
    return %c0_i32, %c0_i32_0 : i32, i32
  }
  func.func @transform_32(%arg0: i32) -> (i32, i32) {
    %c0_i32 = arith.constant 0 : i32
    %c0_i32_0 = arith.constant 0 : i32
    %c0_i32_1 = arith.constant 0 : i32
    return %c0_i32, %c0_i32_0 : i32, i32
  }
  func.func @transform_33(%arg0: i32) -> (i32, i32) {
    %c0_i32 = arith.constant 0 : i32
    %c0_i32_0 = arith.constant 0 : i32
    %c0_i32_1 = arith.constant 0 : i32
    return %c0_i32, %c0_i32_0 : i32, i32
  }
  func.func @transform_34(%arg0: i32) -> (i32, i32) {
    %c0_i32 = arith.constant 0 : i32
    %c0_i32_0 = arith.constant 0 : i32
    %c0_i32_1 = arith.constant 0 : i32
    return %c0_i32, %c0_i32_0 : i32, i32
  }
  func.func @transform_35(%arg0: i32) -> (i32, i32) {
    %c0_i32 = arith.constant 0 : i32
    %c0_i32_0 = arith.constant 0 : i32
    %c0_i32_1 = arith.constant 0 : i32
    return %c0_i32, %c0_i32_0 : i32, i32
  }
  func.func @transform_36(%arg0: i32) -> (i32, i32) {
    %c0_i32 = arith.constant 0 : i32
    %c0_i32_0 = arith.constant 0 : i32
    %c0_i32_1 = arith.constant 0 : i32
    return %c0_i32, %c0_i32_0 : i32, i32
  }
  func.func @transform_37(%arg0: i32) -> (i32, i32) {
    %c0_i32 = arith.constant 0 : i32
    %c0_i32_0 = arith.constant 0 : i32
    %c0_i32_1 = arith.constant 0 : i32
    return %c0_i32, %c0_i32_0 : i32, i32
  }
  func.func @transform_38(%arg0: i32) -> (i32, i32) {
    %c0_i32 = arith.constant 0 : i32
    %c0_i32_0 = arith.constant 0 : i32
    %c0_i32_1 = arith.constant 0 : i32
    return %c0_i32, %c0_i32_0 : i32, i32
  }
  func.func @transform_39(%arg0: i32) -> (i32, i32) {
    %c0_i32 = arith.constant 0 : i32
    %c0_i32_0 = arith.constant 0 : i32
    %c0_i32_1 = arith.constant 0 : i32
    return %c0_i32, %c0_i32_0 : i32, i32
  }
  func.func @transform_40(%arg0: i32) -> (i32, i32) {
    %c0_i32 = arith.constant 0 : i32
    %c0_i32_0 = arith.constant 0 : i32
    %c0_i32_1 = arith.constant 0 : i32
    return %c0_i32, %c0_i32_0 : i32, i32
  }
  func.func @transform_41(%arg0: i32) -> (i32, i32, i32) {
    %c0_i32 = arith.constant 0 : i32
    %c0_i32_0 = arith.constant 0 : i32
    %c0_i32_1 = arith.constant 0 : i32
    return %arg0, %c0_i32, %c0_i32_0 : i32, i32, i32
  }
}

</mosaic_0001>

<bundles_post_ra>
// kernel: degree_forward.1
= control target key start
LH: loop header
LB: loop body
LE: loop exit
PB: predicated region body
PF: predicated region fallthrough
CT: control target
= control target key end

     0   :  { %s2929_s6 = smov 1   ;;  %s2930_s10 = smov 2   ;;  %s3470_s0 = inlined_call_operand.smem [shape: u32[42], index: -1, kind: input, shape index: {}] }
   0x1   :  { %s2987_s5 = sld [smem:[%s3470_s0]]   ;;  %s2931_s14 = smov 3  }
   0x2   :  { %s2992_s9 = sld [smem:[%s3470_s0 + %s2929_s6]]   ;;  %s2932_s18 = smov 4  }
   0x3   :  { %s2997_s13 = sld [smem:[%s3470_s0 + %s2930_s10]]   ;;  %s2933_s22 = smov 5  }
   0x4   :  { %s3002_s17 = sld [smem:[%s3470_s0 + %s2931_s14]]   ;;  %s2934_s26 = smov 6  }
   0x5   :  { %s3007_s21 = sld [smem:[%s3470_s0 + %s2932_s18]]   ;;  %s2935_s30 = smov 7  }
   0x6   :  { %s3012_s25 = sld [smem:[%s3470_s0 + %s2933_s22]]   ;;  %s2936_s4 = smov 8  }
   0x7   :  { %s3017_s29 = sld [smem:[%s3470_s0 + %s2934_s26]]   ;;  %s2937_s10 = smov 9  }
   0x8   :  { %s3022_s3 = sld [smem:[%s3470_s0 + %s2935_s30]]   ;;  %s2938_s15 = smov 10  }
   0x9   :  { %s3027_s8 = sld [smem:[%s3470_s0 + %s2936_s4]]   ;;  %s2939_s20 = smov 11  }
   0xa   :  { %3477 = sst [smem:[#allocation2_spill]] %s3002_s17  ;;  %s2940_s26 = smov 12  }
   0xb   :  { %3478 = sst [smem:[#allocation3_spill]] %s3007_s21  ;;  %s2941_s1 = smov 13  }
   0xc   :  { %s3032_s14 = sld [smem:[%s3470_s0 + %s2937_s10]]   ;;  %s2942_s7 = smov 14  }
   0xd   :  { %s3037_s19 = sld [smem:[%s3470_s0 + %s2938_s15]]   ;;  %s2943_s15 = smov 15  }
   0xe   :  { %s3042_s24 = sld [smem:[%s3470_s0 + %s2939_s20]]   ;;  %s2944_s22 = smov 16  }
   0xf   :  { %s3047_s30 = sld [smem:[%s3470_s0 + %s2940_s26]]   ;;  %s2945_s28 = smov 17  }
  0x10   :  { %s3052_s6 = sld [smem:[%s3470_s0 + %s2941_s1]]  }
  0x11   :  { %s3057_s12 = sld [smem:[%s3470_s0 + %s2942_s7]]   ;;  %s2946_s7 = smov 18  }
  0x12   :  { %s3062_s20 = sld [smem:[%s3470_s0 + %s2943_s15]]   ;;  %s2947_s15 = smov 19  }
  0x13   :  { %s3067_s27 = sld [smem:[%s3470_s0 + %s2944_s22]]   ;;  %s2948_s22 = smov 20  }
  0x14   :  { %s3072_s4 = sld [smem:[%s3470_s0 + %s2945_s28]]   ;;  %s2949_s28 = smov 21  }
  0x15   :  { %3479 = sst [smem:[#allocation4_spill]] %s3047_s30 }
  0x16   :  { %3480 = sst [smem:[#allocation5_spill]] %s3052_s6 }
  0x17   :  { %s3077_s21 = sld [smem:[%s3470_s0 + %s2946_s7]]   ;;  %s2950_s7 = smov 22  }
  0x18   :  { %3481 = sst [smem:[#allocation6_spill]] %s3062_s20 }
  0x19   :  { %s3082_s20 = sld [smem:[%s3470_s0 + %s2947_s15]]   ;;  %s2951_s15 = smov 23  }
  0x1a   :  { %3482 = sst [smem:[#allocation7_spill]] %s3072_s4 }
  0x1b   :  { %s3087_s17 = sld [smem:[%s3470_s0 + %s2948_s22]]   ;;  %s2952_s22 = smov 24  }
  0x1c   :  { %s3092_s4 = sld [smem:[%s3470_s0 + %s2949_s28]]   ;;  %s2953_s28 = smov 25  }
  0x1d   :  { %3483 = sst [smem:[#allocation8_spill]] %s3077_s21 }
  0x1e   :  { %s3097_s21 = sld [smem:[%s3470_s0 + %s2950_s7]]   ;;  %s2954_s7 = smov 26  }
  0x1f   :  { %3484 = sst [smem:[#allocation9_spill]] %s3082_s20 }
  0x20   :  { %s3102_s20 = sld [smem:[%s3470_s0 + %s2951_s15]]   ;;  %s2955_s15 = smov 27  }
  0x21   :  { %s3107_s6 = sld [smem:[%s3470_s0 + %s2952_s22]]   ;;  %s2956_s22 = smov 28  }
  0x22   :  { %s3112_s30 = sld [smem:[%s3470_s0 + %s2953_s28]]   ;;  %s2957_s28 = smov 29  }
  0x24   :  { %3485 = sst [smem:[#allocation10_spill]] %s3097_s21 }
  0x25   :  { %s3117_s21 = sld [smem:[%s3470_s0 + %s2954_s7]]   ;;  %s2958_s7 = smov 30  }
  0x26   :  { %3486 = sst [smem:[#allocation11_spill]] %s3102_s20 }
  0x27   :  { %3487 = sst [smem:[#allocation12_spill]] %s3107_s6 }
  0x28   :  { %3488 = sst [smem:[#allocation13_spill]] %s3112_s30 }
  0x29   :  { %s3122_s20 = sld [smem:[%s3470_s0 + %s2955_s15]]   ;;  %s2959_s15 = smov 31  }
  0x2a   :  { %s3127_s6 = sld [smem:[%s3470_s0 + %s2956_s22]]   ;;  %s2960_s22 = smov 32  }
  0x2b   :  { %3489 = sst [smem:[#allocation14_spill]] %s3117_s21 }
  0x2c   :  { %s3132_s30 = sld [smem:[%s3470_s0 + %s2957_s28]]   ;;  %s2961_s28 = smov 33  }
  0x2d   :  { %s3137_s21 = sld [smem:[%s3470_s0 + %s2958_s7]]   ;;  %s2962_s7 = smov 34  }
  0x2f   :  { %3490 = sst [smem:[#allocation15_spill]] %s3122_s20 }
  0x30   :  { %3491 = sst [smem:[#allocation16_spill]] %s3127_s6 }
  0x31   :  { %s3142_s20 = sld [smem:[%s3470_s0 + %s2959_s15]]   ;;  %s2963_s15 = smov 35  }
  0x32   :  { %3492 = sst [smem:[#allocation17_spill]] %s3132_s30 }
  0x33   :  { %3493 = sst [smem:[#allocation18_spill]] %s3137_s21 }
  0x34   :  { %s3147_s6 = sld [smem:[%s3470_s0 + %s2960_s22]]   ;;  %s2964_s22 = smov 36  }
  0x35   :  { %s3152_s30 = sld [smem:[%s3470_s0 + %s2961_s28]]   ;;  %s2965_s28 = smov 37  }
  0x36   :  { %s3157_s21 = sld [smem:[%s3470_s0 + %s2962_s7]]   ;;  %s2966_s7 = smov 38  }
  0x37   :  { %3494 = sst [smem:[#allocation19_spill]] %s3142_s20 }
  0x38   :  { %s3162_s20 = sld [smem:[%s3470_s0 + %s2963_s15]]   ;;  %s2967_s15 = smov 39  }
  0x3a   :  { %3495 = sst [smem:[#allocation20_spill]] %s3147_s6 }
  0x3b   :  { %3496 = sst [smem:[#allocation21_spill]] %s3152_s30 }
  0x3c   :  { %3497 = sst [smem:[#allocation22_spill]] %s3157_s21 }
  0x3d   :  { %s3167_s6 = sld [smem:[%s3470_s0 + %s2964_s22]]   ;;  %s2968_s22 = smov 40  }
  0x3e   :  { %3498 = sst [smem:[#allocation23_spill]] %s3162_s20 }
  0x3f   :  { %s3172_s30 = sld [smem:[%s3470_s0 + %s2965_s28]]   ;;  %s2969_s28 = smov 41  }
  0x40   :  { %s3177_s21 = sld [smem:[%s3470_s0 + %s2966_s7]]   ;;  %s3194_s7 = smov 0  }
  0x41   :  { %s3182_s20 = sld [smem:[%s3470_s0 + %s2967_s15]]  }
  0x43   :  { %3499 = sst [smem:[#allocation24_spill]] %s3167_s6 }
  0x44   :  { %s3187_s6 = sld [smem:[%s3470_s0 + %s2968_s22]]  }
  0x45   :  { %3500 = sst [smem:[#allocation25_spill]] %s3172_s30 }
  0x46   :  { %s3192_s30 = sld [smem:[%s3470_s0 + %s2969_s28]]  }
  0x47 LB: > { %s2611_s10 = sadd.s32 4294967295, %s2927_s7   ;;  %p2615_p0 = scmp.ge.s32.totalorder %s2927_s7, 1  ;;  %s2927_s7 = sphi %s3194_s7, %s93_s7  }
  0x48   : > { %p1162_p1 = scmp.lt.s32.totalorder %s2927_s7, 3 }
  0x4a   : > { %p1163_p2 = pnand %p2615_p0, %p1162_p1 }
  0x4b   : > { %p1273_p3 = scmp.lt.s32.totalorder (!%p1163_p2), %s2611_s10, 1  ;;  %s2972_s15 = smov (!%p1163_p2), 80  }
  0x4c   : > { %1166 = sbr.rel (%p1163_p2) target bundleno = 4875 (0x130b), region = 184  ;;  %s2973_s16 = smov (!%p1163_p2), 96  }
  0x4d   : > { %s2974_s18 = smov (!%p1163_p2), 112   ;;  %s2976_s23 = smov (!%p1163_p2), 64  }
  0x4e   : > { %s3503_s28 = sld [smem:[#allocation4_spill]] (!%p1163_p2) }
  0x4f   : > { %s3504_s1 = sld [smem:[#allocation5_spill]] (!%p1163_p2) }
  0x50   : > { %s3505_s2 = sld [smem:[#allocation2_spill]] (!%p1163_p2) }
  0x51   : > { %v3203_v0 = vld [vmem:[%s3012_s25 + $0x78] sm:$0xff]  ;;  %v3206_v1 = vld [vmem:[%s3012_s25 + $0x70] sm:$0xff]  ;;  %v2970_v2 = vmov 0   ;;  %s3528_s10 = smov (!%p1273_p3, %s2611_s10), 1  ;;  %v1308_v4 = vld [vmem:[%s3012_s25 + $0x68] sm:$0xff]  ;;  %v1311_v20 = vlaneseq  ;;  %v2971_v23 = vmov 1.0  }
  0x52   : > { %2838 = vset.pattern.permute.xlu0 %v2970_v2  ;;  %1321 = vmatpush.msra.mxu0 %v3203_v0  ;;  %v2383_v3 = vpack.c.bf16 %v3203_v0, %v3206_v1  ;;  %s3217_s0 = sshll.u32 %s3528_s10, 3  ;;  %v1307_v5 = vld [vmem:[%s3012_s25 + $0x60] sm:$0xff]  ;;  %v1306_v6 = vld [vmem:[%s3012_s25 + $0x58] sm:$0xff]  ;;  %v1305_v8 = vld [vmem:[%s3012_s25 + $0x50] sm:$0xff]  ;;  %vm1396_vm1 = vcmask 261120   ;;  %vm1422_vm2 = vcmask 130048   ;;  %s1279_s22 = scalar_lea.vmem %s2992_s9, %s3528_s10 }
  0x53   : > { %2839 = vset.pattern.permute.xlu2 %v2970_v2  ;;  %1349 = vmatpush.msra.mxu1 %v3203_v0  ;;  %s1276_s11 = scalar_lea.vmem %s2987_s5, %s3217_s0  ;;  %v1304_v9 = vld [vmem:[%s3012_s25 + $0x48] sm:$0xff]  ;;  %v1303_v10 = vld [vmem:[%s3012_s25 + $0x40] sm:$0xff]  ;;  %v1302_v11 = vld [vmem:[%s3012_s25 + $0x38] sm:$0xff]  ;;  %v3237_v21 = vand.u32 127, %v1311_v20  ;;  %v2975_v40 = vmov -1e+09   ;;  %s1283_s26 = scalar_lea.vmem %s2997_s13, %s3217_s0 }
  0x54   : > { %1322 = vmatpush.msra.mxu0 %v3206_v1  ;;  %2840 = vset.pattern.permute.xlu1 %v2970_v2  ;;  %v1313_v7 = vld [vmem:[%s1276_s11] sm:$0xff]  ;;  %v1301_v12 = vld [vmem:[%s3012_s25 + $0x30] sm:$0xff]  ;;  %v1300_v13 = vld [vmem:[%s3012_s25 + $0x28] sm:$0xff]  ;;  %vm1447_vm4 = vcmask 64512   ;;  %vm1465_vm5 = vcmask 1043456   ;;  %s3506_s11 = sld [smem:[#allocation6_spill]] }
  0x55   : > { %1350 = vmatpush.msra.mxu1 %v3206_v1  ;;  %1315 = vperm.xlu0 %2838, %v1313_v7   ;;  %v1299_v14 = vld [vmem:[%s3012_s25 + $0x20] sm:$0xff]  ;;  %v1298_v15 = vld [vmem:[%s3012_s25 + $0x18] sm:$0xff]  ;;  %v1297_v16 = vld [vmem:[%s3012_s25 + $0x10] sm:$0xff]  ;;  %vm1542_vm7 = vcmp.ge.s32.totalorder %v3237_v21, 16  ;;  %vm1543_vm8 = vcmp.lt.s32.totalorder %v3237_v21, 32  ;;  %vm1483_vm9 = vcmp.lt.s32.totalorder %v3237_v21, 16 }
  0x56   : > { %1323 = vmatpush.msra.mxu0 %v1308_v4  ;;  %v1296_v17 = vld [vmem:[%s3012_s25 + $0x8] sm:$0xff]  ;;  %v1295_v18 = vld [vmem:[%s3012_s25] sm:$0xff]  ;;  %vm3281_vm10 = vmand %vm1542_vm7, %vm1543_vm8 }
  0x57   : > { %1351 = vmatpush.msra.mxu1 %v1308_v4  ;;  %v2755_v19 = vld [vmem:[%s3027_s8 + $0x8] sm:$0xff]  ;;  %v2754_v24 = vld [vmem:[%s3027_s8] sm:$0xff]  ;;  %v2909_v0 = vld [vmem:[%s3012_s25 + $0x58] sm:$0xff] }
  0x58   : > { %1324 = vmatpush.msra.mxu0 %v1307_v5  ;;  %1406 = vmatpush.bf16.msra.mxu2 %v2755_v19  ;;  %v1320_v25 = vld [vmem:[%s3017_s29] sm:$0xff]  ;;  %v2910_v1 = vld [vmem:[%s3012_s25 + $0x50] sm:$0xff] }
  0x59   : > { %1352 = vmatpush.msra.mxu1 %v1307_v5  ;;  %v2841_v29 = vld [vmem:[%s3032_s14] ss:$0 sm:$0xff] }
  0x5a   : > { %1325 = vmatpush.msra.mxu0 %v1306_v6  ;;  %v1369_v39 = vld [vmem:[%s1279_s22] sm:$0x1]  ;;  %s3507_s22 = sld [smem:[#allocation7_spill]] }
  0x5b   : > { %1353 = vmatpush.msra.mxu1 %v1306_v6  ;;  %vm1370_vm3 = vcmp.gt.f32.partialorder %v1369_v39, 0.0  ;;  %v1341_v4 = vld [vmem:[%s1283_s26] sm:$0xff]  ;;  %s3509_s26 = sld [smem:[#allocation10_spill]] }
  0x5c   : > { %1326 = vmatpush.msra.mxu0 %v1305_v8  ;;  %1407 = vmatpush.bf16.msra.mxu2 %v2754_v24  ;;  %v1371_v41 = vsel %vm1370_vm3, 0.0, %v2975_v40  ;;  %vm1704_vm3 = vcmask 523264  }
  0x5d   : > { %1354 = vmatpush.msra.mxu1 %v1305_v8  ;;  %v3259_v42 = vperm.slane %v1371_v41, 0  ;;  %v2843_v41 = vld [vmem:[%s3092_s4] ss:$0 sm:$0xff] }
  0x5e   : > { %1327 = vmatpush.msra.mxu0 %v1304_v9 }
  0x5f   : > { %1355 = vmatpush.msra.mxu1 %v1304_v9 }
  0x60   : > { %1328 = vmatpush.msra.mxu0 %v1303_v10 }
  0x61   : > { %1356 = vmatpush.msra.mxu1 %v1303_v10 }
  0x62   : > { %1329 = vmatpush.msra.mxu0 %v1302_v11 }
  0x63   : > { %1357 = vmatpush.msra.mxu1 %v1302_v11 }
  0x64   : > { %1330 = vmatpush.msra.mxu0 %v1301_v12 }
  0x65   : > { %1358 = vmatpush.msra.mxu1 %v1301_v12 }
  0x66   : > { %1331 = vmatpush.msra.mxu0 %v1300_v13 }
  0x67   : > { %1359 = vmatpush.msra.mxu1 %v1300_v13 }
  0x68   : > { %1332 = vmatpush.msra.mxu0 %v1299_v14 }
  0x69   : > { %1360 = vmatpush.msra.mxu1 %v1299_v14  ;;  %v2757_v14 = vld [vmem:[%s3037_s19 + $0x8] sm:$0xff] }
  0x6a   : > { %1333 = vmatpush.msra.mxu0 %v1298_v15 }
  0x6b   : > { %1361 = vmatpush.msra.mxu1 %v1298_v15  ;;  %v2756_v15 = vld [vmem:[%s3037_s19] sm:$0xff] }
  0x6c   : > { %1334 = vmatpush.msra.mxu0 %v1297_v16 }
  0x6d   : > { %1362 = vmatpush.msra.mxu1 %v1297_v16  ;;  %v2765_v16 = vld [vmem:[%s3087_s17 + $0x8] sm:$0xff] }
  0x6e   : > { %1335 = vmatpush.msra.mxu0 %v1296_v17 }
  0x6f   : > { %1363 = vmatpush.msra.mxu1 %v1296_v17 }
  0x70   : > { %1336 = vmatpush.msra.mxu0 %v1295_v18 }
  0x71   : > { %1364 = vmatpush.msra.mxu1 %v1295_v18 }
  0x73   : > { %1574 = vmatpush.bf16.msrb.mxu1 %v2757_v14 }
  0x77   : > { %1575 = vmatpush.bf16.msrb.mxu1 %v2756_v15 }
  0xc7   : > { %v1316_v22 = vpop.permute.xlu0 %1315 }
  0xc8   : > { %vm1317_vm0 = vcmp.eq.s32.totalorder %v1316_v22, %v3237_v21 }
  0xc9   : > { %2620 = vmatmul.msk.f32.vlgmr.msra.gmra.mxu0 %vm1317_vm0, %v2971_v23 }
 0x146   : > { %v1338_v26 = vpop.f32.mrf.mxu0 }
 0x147   : > { %v3243_v27 = vadd.f32 %v1338_v26, %v1320_v25 }
 0x149   : > { %v1375_v28 = vpack.c.bf16 %v3243_v27, %v3243_v27 }
 0x14b   : > { %2631 = vmatmul.msk.bf16.vlgmr.msra.gmra.mxu2 %vm1396_vm1, %v1375_v28 }
 0x1ce   : > { %v1409_v30 = vpop.f32.mrf.mxu2 }
 0x1cf   : > { %v1410_v31 = vadd.f32 %v2841_v29, %v1409_v30  ;;  %v2764_v29 = vld [vmem:[%s3087_s17] sm:$0xff] }
 0x1d0   : > { %v1348_v30 = vld [vmem:[%s3022_s3] sm:$0xff] }
 0x1d1   : > { %v1418_v32 = vpack.c.bf16 %v1410_v31, %v1410_v31 }
 0x1d3   : > { %1491 = vrot.lane.b32.xlu1 %v1418_v32, %s2972_s15  ;;  %1420 = vrot.lane.b32.xlu0 %v1418_v32, %s2973_s16 }
 0x1d6   : > { %v1411_v33 = vpop.f32.mrf.mxu2 }
 0x1db   : > { %1489 = vrot.lane.b32.xlu1 %v1418_v32, %s2974_s18 }
 0x245   : > { %v1492_v34 = vpop.permute.xlu1 %1491  ;;  %v1421_v35 = vpop.permute.xlu0 %1420 }
 0x246   : > { %v1427_v36 = vsel %vm1422_vm2, %v1421_v35, 0  ;;  %v1497_v37 = vsel %vm1422_vm2, %v1492_v34, 0  ;;  %v2842_v34 = vld [vmem:[%s3042_s24] ss:$0 sm:$0xff] }
 0x247   : > { %1436 = vmatpush.bf16.xpose.msrb.mxu0 %v1427_v36  ;;  %1506 = vmatpush.bf16.xpose.msra.mxu3 %v1497_v37 }
 0x24d   : > { %v1490_v38 = vpop.permute.xlu1 %1489 }
 0x24e   : > { %2632 = vmatmul.msk.bf16.vlgmr.msrb.gmra.mxu0 %vm1422_vm2, %v1418_v32  ;;  %2634 = vmatmul.msk.bf16.vlgmr.msra.gmra.mxu3 %vm1422_vm2, %v1490_v38 }
 0x2cb   : > { %v1438_v43 = vpop.f32.mrf.mxu0 }
 0x2cc   : > { %v1442_v44 = vmul.f32 0.25, %v1438_v43 }
 0x2ce   : > { %v1446_v45 = vadd.f32 %v3259_v42, %v1442_v44 }
 0x2d0   : > { %v1448_v46 = vsel %vm1447_vm4, %v1446_v45, -inf }
 0x2d1   : > { %v1508_v47 = vpop.f32.mrf.mxu3  ;;  %1449 = vmax.xlane.f32.xlu2 %v1448_v46 }
 0x2d2   : > { %v1512_v48 = vmul.f32 0.25, %v1508_v47  ;;  %v2977_v47 = vmov 32.0  }
 0x2d3   : > { %v1440_v49 = vpop.f32.mrf.mxu0 }
 0x2d4   : > { %v1513_v50 = vadd.f32 %v1512_v48, %v3259_v42 }
 0x2d6   : > { %v1514_v51 = vsel %vm1447_vm4, %v1513_v50, -inf }
 0x2d9   : > { %v1510_v52 = vpop.f32.mrf.mxu3  ;;  %1515 = vmax.xlane.f32.xlu2 %v1514_v51 }
 0x2da   : > { %v2763_v52 = vld [vmem:[%s3067_s27 + $0x18] sm:$0xff] }
 0x2f1   : > { %1460 = vrot.lane.b32.xlu2 %v1418_v32, %s2976_s23 }
 0x2f9   : > { %1343 = vperm.xlu2 %2839, %v1341_v4   ;;  %v2758_v4 = vld [vmem:[%s3057_s12] sm:$0xff] }
 0x344   : > { %v1450_v53 = vpop.xlane.xlu2 %1449 }
 0x345   : > { %v1451_v54 = vsub.f32 %v1446_v45, %v1450_v53 }
 0x347   : > { %v1452_v55 = vmul.f32 1.442695, %v1451_v54 }
 0x349   : > { %2863 = vpow2.f32 %v1452_v55 }
 0x34c   : > { %v1516_v56 = vpop.xlane.xlu2 %1515 }
 0x34d   : > { %v1517_v57 = vsub.f32 %v1513_v50, %v1516_v56 }
 0x34f   : > { %v2864_v58 = vpop.eup %2863  ;;  %v1518_v59 = vmul.f32 1.442695, %v1517_v57 }
 0x350   : > { %v1454_v60 = vsel %vm1447_vm4, %v2864_v58, 0.0 }
 0x351   : > { %2865 = vpow2.f32 %v1518_v59  ;;  %1455 = vadd.xlane.f32.xlu0 %v1454_v60  ;;  %v2762_v59 = vld [vmem:[%s3067_s27 + $0x10] sm:$0xff]  ;;  %v2761_v60 = vld [vmem:[%s3067_s27 + $0x8] sm:$0xff] }
 0x354   : > { %v1461_v61 = vpop.permute.xlu2 %1460 }
 0x355   : > { %v1467_v62 = vsel %vm1465_vm5, %v1461_v61, 0  ;;  %v2760_v61 = vld [vmem:[%s3067_s27] sm:$0xff] }
 0x356   : > { %1476 = vmatpush.bf16.msrb.mxu2 %v1467_v62  ;;  %1536 = vmatpush.bf16.msra.mxu0 %v1467_v62 }
 0x357   : > { %v2866_v63 = vpop.eup %2865 }
 0x358   : > { %v1520_v2 = vsel %vm1447_vm4, %v2866_v63, 0.0 }
 0x359   : > { %1521 = vadd.xlane.f32.xlu1 %v1520_v2  ;;  %v2759_v2 = vld [vmem:[%s3057_s12 + $0x8] sm:$0xff] }
 0x35a   : > { %1792 = vmatpush.bf16.msrb.mxu0 %v2765_v16  ;;  %1660 = vmatpush.bf16.msra.mxu2 %v2759_v2  ;;  %v2844_v16 = vld [vmem:[%s3503_s28] ss:$0 sm:$0xff]  ;;  %s3510_s28 = sld [smem:[#allocation8_spill]] }
 0x35c   : > { %v1344_v13 = vpop.permute.xlu2 %1343 }
 0x35d   : > { %vm1345_vm6 = vcmp.eq.s32.totalorder %v1344_v13, %v3237_v21 }
 0x35e   : > { %2622 = vmatmul.msk.f32.vlgmr.msra.gmra.mxu1 %vm1345_vm6, %v2971_v23  ;;  %1793 = vmatpush.bf16.msrb.mxu0 %v2764_v29  ;;  %v1755_v29 = vshrl.u32 %v1311_v20, 7 }
 0x35f   : > { %1712 = vmatpush.bf16.msra.mxu1 %v2763_v52  ;;  %1661 = vmatpush.bf16.msra.mxu2 %v2758_v4 }
 0x360   : > { %vm1756_vm0 = vcmp.le.s32.totalorder %v3237_v21, %v1755_v29 }
 0x363   : > { %1713 = vmatpush.bf16.msra.mxu1 %v2762_v59 }
 0x367   : > { %1714 = vmatpush.bf16.msra.mxu1 %v2761_v60 }
 0x36b   : > { %1715 = vmatpush.bf16.msra.mxu1 %v2760_v61 }
 0x3c4   : > { %v1456_v5 = vpop.xlane.xlu0 %1455 }
 0x3c5   : > { %2867 = vrcp.f32 %v1456_v5 }
 0x3cb   : > { %v2868_v6 = vpop.eup %2867 }
 0x3cc   : > { %v1458_v7 = vmul.f32 %v2868_v6, %v2864_v58  ;;  %v1522_v8 = vpop.xlane.xlu1 %1521 }
 0x3cd   : > { %2869 = vrcp.f32 %v1522_v8 }
 0x3ce   : > { %v1459_v9 = vpack.c.bf16 %v1458_v7, %v1458_v7  ;;  %2871 = vrcp.f32 %v2977_v47 }
 0x3d0   : > { %2633 = vmatmul.msk.bf16.vlgmr.msrb.gmra.mxu2 %vm1447_vm4, %v1459_v9 }
 0x3d3   : > { %v2870_v10 = vpop.eup %2869 }
 0x3d4   : > { %v1524_v11 = vmul.f32 %v2870_v10, %v2866_v63 }
 0x3d6   : > { %v1525_v12 = vpack.c.bf16 %v1524_v11, %v1524_v11 }
 0x3d8   : > { %2635 = vmatmul.msk.bf16.vlgmr.msra.gmra.mxu0 %vm1447_vm4, %v1525_v12 }
 0x3db   : > { %v1366_v31 = vpop.f32.mrf.mxu1 }
 0x3dc   : > { %v3292_v32 = vadd.f32 %v1366_v31, %v1348_v30 }
 0x3de   : > { %v1762_v33 = vpack.c.bf16 %v3292_v32, %v3292_v32 }
 0x3e8   : > { %2679 = vmatmul.msk.bf16.vlgmr.msrb.gmra.mxu0 %vm1396_vm1, %v1762_v33  ;;  %v1757_v33 = vsel %vm1756_vm0, 0.0, %v2975_v40 }
 0x453   : > { %v1478_v17 = vpop.f32.mrf.mxu2 }
 0x454   : > { %v1487_v22 = vsel %vm1483_vm9, %v1478_v17, 0.0 }
 0x455   : > { %v1538_v19 = vpop.f32.mrf.mxu0 }
 0x456   : > { %v1547_v23 = vsel %vm3281_vm10, %v1538_v19, 0.0  ;;  %v2845_v19 = vld [vmem:[%s3504_s1] ss:$0 sm:$0xff]  ;;  %s3511_s1 = sld [smem:[#allocation9_spill]] }
 0x457   : > { %v1548_v24 = vadd.f32 %v1547_v23, %v1487_v22 }
 0x459   : > { %v1549_v25 = vpack.c.bf16 %v1548_v24, %v1548_v24 }
 0x45b   : > { %v1480_v26 = vpop.f32.mrf.mxu2  ;;  %2644 = vmatmul.msk.bf16.vlgmr.msrb.gmra.mxu1 %vm1396_vm1, %v1549_v25 }
 0x45d   : > { %v1540_v28 = vpop.f32.mrf.mxu0 }
 0x465   : > { %v1795_v43 = vpop.f32.mrf.mxu0 }
 0x466   : > { %v1796_v44 = vadd.f32 %v2843_v41, %v1795_v43 }
 0x468   : > { %v3301_v45 = vpack.c.bf16 %v1796_v44, %v1796_v44 }
 0x46a   : > { %1806 = vrot.lane.b32.xlu1 %v3301_v45, %s2973_s16 }
 0x46d   : > { %v1797_v46 = vpop.f32.mrf.mxu0 }
 0x472   : > { %1864 = vrot.lane.b32.xlu1 %v3301_v45, %s2974_s18 }
 0x4d8   : > { %v1577_v35 = vpop.f32.mrf.mxu1 }
 0x4d9   : > { %v1578_v36 = vadd.f32 %v2842_v34, %v1577_v35 }
 0x4db   : > { %v1581_v37 = vadd.f32 %v1578_v36, %v3243_v27  ;;  %v2872_v27 = vpop.eup %2871  ;;  %v2846_v36 = vld [vmem:[%s3506_s11] ss:$0 sm:$0xff]  ;;  %s3513_s11 = sld [smem:[#allocation14_spill]] }
 0x4dc   : > { %v1588_v48 = vmul.f32 32.0, %v2872_v27  ;;  %vm1592_vm11 = vweird.f32 %v2872_v27  ;;  %v1807_v62 = vpop.permute.xlu1 %1806 }
 0x4dd   : > { %v1584_v38 = vsel %vm1396_vm1, %v1581_v37, 0.0  ;;  %v1812_v63 = vsel %vm1422_vm2, %v1807_v62, 0 }
 0x4de   : > { %1585 = vadd.xlane.f32.xlu2 %v1584_v38  ;;  %v1589_v49 = vsub.f32 1.0, %v1588_v48  ;;  %1821 = vmatpush.bf16.xpose.msrb.mxu1 %v1812_v63  ;;  %v2847_v63 = vld [vmem:[%s3507_s22] ss:$0 sm:$0xff]  ;;  %s3515_s22 = sld [smem:[#allocation12_spill]] }
 0x4e0   : > { %v1579_v39 = vpop.f32.mrf.mxu1  ;;  %v1590_v50 = vmul.f32 %v2872_v27, %v1589_v49 }
 0x4e2   : > { %v1591_v51 = vadd.f32 %v2872_v27, %v1590_v50 }
 0x4e4   : > { %v3308_v53 = vsel %vm1592_vm11, %v2872_v27, %v1591_v51  ;;  %v1865_v24 = vpop.permute.xlu1 %1864 }
 0x551   : > { %v1586_v54 = vpop.xlane.xlu2 %1585 }
 0x552   : > { %v1594_v55 = vmul.f32 %v3308_v53, %v1586_v54 }
 0x554   : > { %v1595_v56 = vsub.f32 %v1581_v37, %v1594_v55 }
 0x556   : > { %v1596_v57 = vmul.f32 %v1595_v56, %v1595_v56 }
 0x558   : > { %v1597_v58 = vsel %vm1396_vm1, %v1596_v57, 0.0 }
 0x559   : > { %1598 = vadd.xlane.f32.xlu0 %v1597_v58 }
 0x56d   : > { %1866 = vrot.lane.b32.xlu0 %v3301_v45, %s2972_s15  ;;  %s1286_s15 = scalar_lea.vmem %s3505_s2, %s3528_s10  ;;  %s3512_s2 = sld [smem:[#allocation17_spill]] }
 0x56e   : > { %v1372_v28 = vld [vmem:[%s1286_s15] sm:$0x1]  ;;  %s3514_s15 = sld [smem:[#allocation11_spill]] }
 0x56f   : > { %vm1373_vm15 = vcmp.gt.f32.partialorder %v1372_v28, 0.0 }
 0x570   : > { %v1374_v30 = vsel %vm1373_vm15, 0.0, %v2975_v40 }
 0x571   : > { %v1759_v31 = vperm.slane %v1374_v30, 0 }
 0x573   : > { %v1761_v34 = vadd.f32 %v1759_v31, %v1757_v33 }
 0x5cc   : > { %v1599_v5 = vpop.xlane.xlu0 %1598 }
 0x5cd   : > { %v1600_v6 = vmul.f32 %v1599_v5, %v3308_v53 }
 0x5cf   : > { %v1601_v7 = vadd.f32 1e-05, %v1600_v6 }
 0x5d1   : > { %2873 = vrsqrt.f32 %v1601_v7  ;;  %vm1608_vm13 = vweird.f32 %v1601_v7 }
 0x5d7   : > { %v2874_v8 = vpop.eup %2873 }
 0x5d8   : > { %v1603_v9 = vmul.f32 %v2874_v8, %v1601_v7  ;;  %vm1609_vm12 = vweird.f32 %v2874_v8 }
 0x5d9   : > { %vm1610_vm14 = vmor %vm1608_vm13, %vm1609_vm12 }
 0x5da   : > { %v1604_v10 = vmul.f32 %v2874_v8, %v1603_v9 }
 0x5dc   : > { %v1605_v11 = vmul.f32 0.5, %v1604_v10 }
 0x5de   : > { %v1606_v12 = vsub.f32 1.5, %v1605_v11 }
 0x5df   : > { %v1867_v13 = vpop.permute.xlu0 %1866 }
 0x5e0   : > { %v1607_v14 = vmul.f32 %v2874_v8, %v1606_v12  ;;  %v1872_v15 = vsel %vm1422_vm2, %v1867_v13, 0 }
 0x5e1   : > { %1881 = vmatpush.bf16.xpose.msrb.mxu3 %v1872_v15 }
 0x5e2   : > { %v1611_v17 = vsel %vm1610_vm14, %v2874_v8, %v1607_v14 }
 0x5e3   : > { %v1612_v22 = vmul.f32 %v1611_v17, %v1595_v56 }
 0x5e5   : > { %v1616_v23 = vmul.f32 %v2844_v16, %v1612_v22 }
 0x5e7   : > { %v1620_v25 = vadd.f32 %v2845_v19, %v1616_v23 }
 0x5e8   : > { %2682 = vmatmul.msk.bf16.vlgmr.msrb.gmra.mxu3 %vm1422_vm2, %v1865_v24 }
 0x5e9   : > { %v1635_v26 = vpack.c.bf16 %v1620_v25, %v1620_v25 }
 0x5eb   : > { %2653 = vmatmul.msk.bf16.vlgmr.msra.gmra.mxu2 %vm1396_vm1, %v1635_v26 }
 0x66b   : > { %v1883_v35 = vpop.f32.mrf.mxu3 }
 0x66c   : > { %v1887_v37 = vmul.f32 0.25, %v1883_v35 }
 0x66e   : > { %v1663_v38 = vpop.f32.mrf.mxu2  ;;  %v1888_v39 = vadd.f32 %v1887_v37, %v1761_v34 }
 0x66f   : > { %v1664_v41 = vadd.f32 %v2846_v36, %v1663_v38  ;;  %v2767_v36 = vld [vmem:[%s3509_s26 + $0x8] sm:$0xff] }
 0x670   : > { %v1889_v43 = vsel %vm1447_vm4, %v1888_v39, -inf }
 0x671   : > { %v1667_v44 = vmul.f32 %v1664_v41, %v1664_v41  ;;  %1890 = vmax.xlane.f32.xlu2 %v1889_v43 }
 0x673   : > { %v1668_v46 = vmul.f32 %v1667_v44, %v1664_v41  ;;  %v1885_v20 = vpop.f32.mrf.mxu3 }
 0x675   : > { %v1669_v47 = vmul.f32 0.044715, %v1668_v46 }
 0x676   : > { %v1665_v27 = vpop.f32.mrf.mxu2 }
 0x677   : > { %v1670_v48 = vadd.f32 %v1669_v47, %v1664_v41 }
 0x679   : > { %v1671_v49 = vmul.f32 0.7978846, %v1670_v48 }
 0x67b   : > { %2875 = vtanh.f32 %v1671_v49  ;;  %v2848_v49 = vld [vmem:[%s3510_s28] ss:$0 sm:$0xff]  ;;  %s3516_s28 = sld [smem:[#allocation13_spill]] }
 0x681   : > { %v2876_v50 = vpop.eup %2875 }
 0x682   : > { %v1673_v40 = vadd.f32 1.0, %v2876_v50 }
 0x684   : > { %v1674_v51 = vmul.f32 0.5, %v1673_v40 }
 0x686   : > { %v1675_v52 = vmul.f32 %v1674_v51, %v1664_v41  ;;  %v2849_v51 = vld [vmem:[%s3511_s1] ss:$0 sm:$0xff]  ;;  %s3517_s1 = sld [smem:[#allocation15_spill]] }
 0x688   : > { %v1676_v54 = vpack.c.bf16 %v1675_v52, %v1675_v52 }
 0x68a   : > { %2670 = vmatmul.msk.bf16.vlgmr.msra.gmra.mxu1 %vm1704_vm3, %v1676_v54 }
 0x68b   : > { %1944 = vmatpush.bf16.msra.mxu1 %v2767_v36 }
 0x69a   : > { %2680 = vmatmul.msk.bf16.vlgmr.msrb.gmra.mxu1 %vm1422_vm2, %v3301_v45 }
 0x6e4   : > { %v1891_v55 = vpop.xlane.xlu2 %1890 }
 0x6e5   : > { %v1892_v56 = vsub.f32 %v1888_v39, %v1891_v55 }
 0x6e7   : > { %v1893_v57 = vmul.f32 1.442695, %v1892_v56  ;;  %v2766_v56 = vld [vmem:[%s3509_s26] sm:$0xff] }
 0x6e8   : > { %1945 = vmatpush.bf16.msra.mxu1 %v2766_v56 }
 0x6e9   : > { %2877 = vpow2.f32 %v1893_v57 }
 0x6ef   : > { %v2878_v58 = vpop.eup %2877 }
 0x6f0   : > { %v1895_v59 = vsel %vm1447_vm4, %v2878_v58, 0.0 }
 0x6f1   : > { %1896 = vadd.xlane.f32.xlu2 %v1895_v59 }
 0x707   : > { %v1717_v60 = vpop.f32.mrf.mxu1 }
 0x708   : > { %v1718_v5 = vadd.f32 %v2847_v63, %v1717_v60  ;;  %v2850_v63 = vld [vmem:[%s3512_s2] ss:$0 sm:$0xff]  ;;  %s3519_s2 = sld [smem:[#allocation19_spill]] }
 0x709   : > { %1841 = vrot.lane.b32.xlu2 %v3301_v45, %s2976_s23  ;;  %s3508_s23 = sld [smem:[#allocation16_spill]] }
 0x70a   : > { %v1721_v8 = vadd.f32 %v1718_v5, %v1620_v25 }
 0x70c   : > { %v1724_v9 = vsel %vm1396_vm1, %v1721_v8, 0.0 }
 0x70f   : > { %v1719_v61 = vpop.f32.mrf.mxu1  ;;  %v2771_v31 = vld [vmem:[%s3508_s23 + $0x8] sm:$0xff] }
 0x710   : > { %2051 = vmatpush.bf16.msra.mxu3 %v2771_v31 }
 0x717   : > { %v1823_v62 = vpop.f32.mrf.mxu1 }
 0x718   : > { %v1827_v2 = vmul.f32 0.25, %v1823_v62 }
 0x71a   : > { %v1828_v4 = vadd.f32 %v1827_v2, %v1761_v34  ;;  %v2770_v34 = vld [vmem:[%s3508_s23] sm:$0xff] }
 0x71b   : > { %2052 = vmatpush.bf16.msra.mxu3 %v2770_v34 }
 0x71c   : > { %v1829_v6 = vsel %vm1447_vm4, %v1828_v4, -inf }
 0x71d   : > { %1830 = vmax.xlane.f32.xlu0 %v1829_v6 }
 0x71f   : > { %v1825_v7 = vpop.f32.mrf.mxu1 }
 0x725   : > { %1725 = vadd.xlane.f32.xlu0 %v1724_v9  ;;  %v2768_v9 = vld [vmem:[%s3513_s11] sm:$0xff] }
 0x764   : > { %v1897_v10 = vpop.xlane.xlu2 %1896 }
 0x765   : > { %2879 = vrcp.f32 %v1897_v10  ;;  %v2851_v10 = vld [vmem:[%s3514_s15] ss:$0 sm:$0xff]  ;;  %s3521_s15 = sld [smem:[#allocation20_spill]] }
 0x76b   : > { %v2880_v11 = vpop.eup %2879 }
 0x76c   : > { %v1899_v12 = vmul.f32 %v2880_v11, %v2878_v58  ;;  %v1842_v13 = vpop.permute.xlu2 %1841 }
 0x76d   : > { %v1847_v45 = vsel %vm1465_vm5, %v1842_v13, 0 }
 0x76e   : > { %v1900_v14 = vpack.c.bf16 %v1899_v12, %v1899_v12  ;;  %1856 = vmatpush.bf16.msrb.mxu2 %v1847_v45  ;;  %1911 = vmatpush.bf16.msra.mxu0 %v1847_v45 }
 0x771   : > { %2683 = vmatmul.msk.bf16.vlgmr.msra.gmra.mxu0 %vm1447_vm4, %v1900_v14 }
 0x790   : > { %v1831_v15 = vpop.xlane.xlu0 %1830 }
 0x791   : > { %v1832_v16 = vsub.f32 %v1828_v4, %v1831_v15 }
 0x793   : > { %v1833_v17 = vmul.f32 1.442695, %v1832_v16 }
 0x795   : > { %2881 = vpow2.f32 %v1833_v17 }
 0x798   : > { %v1726_v19 = vpop.xlane.xlu0 %1725 }
 0x799   : > { %v1727_v22 = vmul.f32 %v1726_v19, %v3308_v53 }
 0x79b   : > { %v2882_v23 = vpop.eup %2881  ;;  %v1728_v24 = vsub.f32 %v1721_v8, %v1727_v22  ;;  %v2769_v8 = vld [vmem:[%s3513_s11 + $0x8] sm:$0xff] }
 0x79c   : > { %v1835_v25 = vsel %vm1447_vm4, %v2882_v23, 0.0  ;;  %2014 = vmatpush.bf16.msra.mxu2 %v2769_v8 }
 0x79d   : > { %1836 = vadd.xlane.f32.xlu1 %v1835_v25  ;;  %v1729_v26 = vmul.f32 %v1728_v24, %v1728_v24 }
 0x79f   : > { %v1730_v28 = vsel %vm1396_vm1, %v1729_v26, 0.0 }
 0x7a0   : > { %2015 = vmatpush.bf16.msra.mxu2 %v2768_v9 }
 0x7a5   : > { %1731 = vadd.xlane.f32.xlu1 %v1730_v28 }
 0x7ee   : > { %v1913_v29 = vpop.f32.mrf.mxu0 }
 0x7ef   : > { %v1917_v58 = vsel %vm3281_vm10, %v1913_v29, 0.0 }
 0x7f6   : > { %v1915_v30 = vpop.f32.mrf.mxu0 }
 0x810   : > { %v1837_v33 = vpop.xlane.xlu1 %1836 }
 0x811   : > { %2883 = vrcp.f32 %v1837_v33 }
 0x817   : > { %v2884_v35 = vpop.eup %2883 }
 0x818   : > { %v1839_v37 = vmul.f32 %v2884_v35, %v2882_v23  ;;  %v1732_v38 = vpop.xlane.xlu1 %1731  ;;  %v2852_v35 = vld [vmem:[%s3515_s22] ss:$0 sm:$0xff]  ;;  %s3522_s22 = sld [smem:[#allocation21_spill]] }
 0x819   : > { %v1733_v39 = vmul.f32 %v1732_v38, %v3308_v53 }
 0x81a   : > { %v1840_v41 = vpack.c.bf16 %v1839_v37, %v1839_v37  ;;  %v2853_v37 = vld [vmem:[%s3516_s28] ss:$0 sm:$0xff]  ;;  %s3523_s28 = sld [smem:[#allocation24_spill]] }
 0x81b   : > { %v1734_v43 = vadd.f32 1e-05, %v1733_v39 }
 0x81c   : > { %2681 = vmatmul.msk.bf16.vlgmr.msrb.gmra.mxu2 %vm1447_vm4, %v1840_v41 }
 0x81d   : > { %2885 = vrsqrt.f32 %v1734_v43  ;;  %vm1741_vm7 = vweird.f32 %v1734_v43 }
 0x823   : > { %v2886_v44 = vpop.eup %2885 }
 0x824   : > { %v1736_v46 = vmul.f32 %v2886_v44, %v1734_v43  ;;  %vm1742_vm6 = vweird.f32 %v2886_v44 }
 0x825   : > { %vm1743_vm8 = vmor %vm1741_vm7, %vm1742_vm6  ;;  %vm2466_vm6 = vcmp.eq.s32.totalorder %v3237_v21, 0 }
 0x826   : > { %v1737_v20 = vmul.f32 %v2886_v44, %v1736_v46 }
 0x828   : > { %v1738_v47 = vmul.f32 0.5, %v1737_v20 }
 0x82a   : > { %v1739_v27 = vsub.f32 1.5, %v1738_v47 }
 0x82c   : > { %v1740_v48 = vmul.f32 %v2886_v44, %v1739_v27 }
 0x82e   : > { %v1744_v50 = vsel %vm1743_vm8, %v2886_v44, %v1740_v48  ;;  %v2854_v44 = vld [vmem:[%s3517_s1] ss:$0 sm:$0xff]  ;;  %s3524_s1 = sld [smem:[#allocation23_spill]] }
 0x82f   : > { %v1745_v40 = vmul.f32 %v1744_v50, %v1728_v24 }
 0x831   : > { %v1749_v52 = vmul.f32 %v2848_v49, %v1745_v40 }
 0x833   : > { %v1753_v54 = vadd.f32 %v2849_v51, %v1749_v52 }
 0x835   : > { %v2021_v55 = vpack.c.bf16 %v1753_v54, %v1753_v54 }
 0x837   : > { %2710 = vmatmul.msk.bf16.vlgmr.msra.gmra.mxu3 %vm1396_vm1, %v2021_v55 }
 0x89f   : > { %v1858_v57 = vpop.f32.mrf.mxu2 }
 0x8a0   : > { %v1862_v59 = vsel %vm1483_vm9, %v1858_v57, 0.0 }
 0x8a1   : > { %v1918_v60 = vadd.f32 %v1917_v58, %v1862_v59 }
 0x8a3   : > { %v1919_v61 = vpack.c.bf16 %v1918_v60, %v1918_v60 }
 0x8a5   : > { %2692 = vmatmul.msk.bf16.vlgmr.msra.gmra.mxu1 %vm1396_vm1, %v1919_v61 }
 0x8a7   : > { %v1860_v62 = vpop.f32.mrf.mxu2 }
 0x8ba   : > { %v2054_v2 = vpop.f32.mrf.mxu3 }
 0x8bb   : > { %v2055_v4 = vadd.f32 %v2850_v63, %v2054_v2 }
 0x8bd   : > { %v3363_v5 = vpack.c.bf16 %v2055_v4, %v2055_v4 }
 0x8bf   : > { %2125 = vrot.lane.b32.xlu1 %v3363_v5, %s2974_s18  ;;  %v2069_v6 = vsel %vm1422_vm2, %v3363_v5, 0 }
 0x8c0   : > { %2078 = vmatpush.bf16.xpose.msrb.mxu0 %v2069_v6 }
 0x8c2   : > { %v2056_v7 = vpop.f32.mrf.mxu3 }
 0x922   : > { %v1947_v11 = vpop.f32.mrf.mxu1 }
 0x923   : > { %v1948_v12 = vadd.f32 %v2851_v10, %v1947_v11 }
 0x925   : > { %v1951_v13 = vadd.f32 %v1948_v12, %v3292_v32 }
 0x927   : > { %v1954_v45 = vsel %vm1396_vm1, %v1951_v13, 0.0 }
 0x928   : > { %1955 = vadd.xlane.f32.xlu2 %v1954_v45 }
 0x92a   : > { %v1949_v14 = vpop.f32.mrf.mxu1 }
 0x931   : > { %v2126_v15 = vpop.permute.xlu1 %2125 }
 0x932   : > { %v2131_v16 = vsel %vm1422_vm2, %v2126_v15, 0 }
 0x933   : > { %2140 = vmatpush.bf16.xpose.msrb.mxu2 %v2131_v16 }
 0x99b   : > { %v1956_v17 = vpop.xlane.xlu2 %1955 }
 0x99c   : > { %v1957_v19 = vmul.f32 %v1956_v17, %v3308_v53 }
 0x99e   : > { %v1958_v22 = vsub.f32 %v1951_v13, %v1957_v19 }
 0x9a0   : > { %v1959_v23 = vmul.f32 %v1958_v22, %v1958_v22 }
 0x9a2   : > { %v1960_v24 = vsel %vm1396_vm1, %v1959_v23, 0.0 }
 0x9a3   : > { %1961 = vadd.xlane.f32.xlu0 %v1960_v24 }
 0xa16   : > { %v1962_v25 = vpop.xlane.xlu0 %1961 }
 0xa17   : > { %v1963_v32 = vmul.f32 %v1962_v25, %v3308_v53 }
 0xa19   : > { %v1964_v26 = vadd.f32 1e-05, %v1963_v32 }
 0xa1b   : > { %2887 = vrsqrt.f32 %v1964_v26  ;;  %vm1971_vm12 = vweird.f32 %v1964_v26 }
 0xa21   : > { %v2888_v28 = vpop.eup %2887 }
 0xa22   : > { %v1966_v29 = vmul.f32 %v2888_v28, %v1964_v26  ;;  %vm1972_vm11 = vweird.f32 %v2888_v28 }
 0xa23   : > { %vm1973_vm13 = vmor %vm1971_vm12, %vm1972_vm11 }
 0xa24   : > { %v1967_v30 = vmul.f32 %v2888_v28, %v1966_v29  ;;  %v2855_v29 = vld [vmem:[%s3519_s2] ss:$0 sm:$0xff]  ;;  %s3525_s2 = sld [smem:[#allocation25_spill]] }
 0xa26   : > { %v1968_v31 = vmul.f32 0.5, %v1967_v30 }
 0xa28   : > { %v1969_v33 = vsub.f32 1.5, %v1968_v31 }
 0xa2a   : > { %v1970_v34 = vmul.f32 %v2888_v28, %v1969_v33 }
 0xa2c   : > { %v1974_v36 = vsel %vm1973_vm13, %v2888_v28, %v1970_v34 }
 0xa2d   : > { %v1975_v38 = vmul.f32 %v1974_v36, %v1958_v22 }
 0xa2f   : > { %v1979_v39 = vmul.f32 %v2852_v35, %v1975_v38 }
 0xa31   : > { %v3380_v41 = vadd.f32 %v2853_v37, %v1979_v39 }
 0xa33   : > { %v1984_v43 = vpack.c.bf16 %v3380_v41, %v3380_v41 }
 0xa35   : > { %2701 = vmatmul.msk.bf16.vlgmr.msra.gmra.mxu2 %vm1396_vm1, %v1984_v43 }
 0xab8   : > { %v2017_v46 = vpop.f32.mrf.mxu2 }
 0xab9   : > { %v2018_v20 = vadd.f32 %v2854_v44, %v2017_v46 }
 0xabb   : > { %v2064_v47 = vpack.c.bf16 %v2018_v20, %v2018_v20 }
 0xabd   : > { %2123 = vrot.lane.b32.xlu0 %v2064_v47, %s2974_s18  ;;  %2711 = vmatmul.msk.bf16.vlgmr.msrb.gmra.mxu0 %vm1422_vm2, %v2064_v47  ;;  %s3518_s18 = sld [smem:[#allocation18_spill]] }
 0xac0   : > { %v2019_v27 = vpop.f32.mrf.mxu2 }
 0xac3   : > { %v2772_v17 = vld [vmem:[%s3518_s18] sm:$0xff] }
 0xb2f   : > { %v2124_v48 = vpop.permute.xlu0 %2123 }
 0xb30   : > { %2713 = vmatmul.msk.bf16.vlgmr.msrb.gmra.mxu2 %vm1422_vm2, %v2124_v48 }
 0xb3a   : > { %v2080_v49 = vpop.f32.mrf.mxu0 }
 0xb3b   : > { %v2084_v50 = vmul.f32 0.25, %v2080_v49 }
 0xb3d   : > { %v2085_v40 = vadd.f32 %v2084_v50, %v3259_v42 }
 0xb3f   : > { %v2086_v51 = vsel %vm1447_vm4, %v2085_v40, -inf }
 0xb40   : > { %2087 = vmax.xlane.f32.xlu1 %v2086_v51  ;;  %v2856_v51 = vld [vmem:[%s3521_s15] ss:$0 sm:$0xff]  ;;  %s3526_s15 = sld [smem:[#allocation3_spill]] }
 0xb42   : > { %v2082_v52 = vpop.f32.mrf.mxu0 }
 0xbb3   : > { %v2142_v54 = vpop.f32.mrf.mxu2  ;;  %v2088_v55 = vpop.xlane.xlu1 %2087 }
 0xbb4   : > { %v2146_v56 = vmul.f32 0.25, %v2142_v54  ;;  %v2089_v57 = vsub.f32 %v2085_v40, %v2088_v55  ;;  %v2857_v54 = vld [vmem:[%s3522_s22] ss:$0 sm:$0xff]  ;;  %s1290_s22 = scalar_lea.vmem %s3526_s15, %s3217_s0  ;;  %s1293_s0 = scalar_lea.vmem %s3192_s30, %s3528_s10 }
 0xbb6   : > { %v2090_v58 = vmul.f32 1.442695, %v2089_v57  ;;  %v2147_v59 = vadd.f32 %v2146_v56, %v3259_v42 }
 0xbb8   : > { %2889 = vpow2.f32 %v2090_v58  ;;  %v2148_v60 = vsel %vm1447_vm4, %v2147_v59, -inf }
 0xbb9   : > { %2149 = vmax.xlane.f32.xlu0 %v2148_v60  ;;  %v2778_v60 = vld [vmem:[%s3523_s28 + $0x10] sm:$0xff] }
 0xbbb   : > { %v2144_v61 = vpop.f32.mrf.mxu2 }
 0xbbc   : > { %v2777_v61 = vld [vmem:[%s3523_s28 + $0x8] sm:$0xff] }
 0xbbe   : > { %v2890_v62 = vpop.eup %2889 }
 0xbbf   : > { %v2092_v63 = vsel %vm1447_vm4, %v2890_v62, 0.0 }
 0xbc0   : > { %2093 = vadd.xlane.f32.xlu2 %v2092_v63  ;;  %v2858_v63 = vld [vmem:[%s3524_s1] ss:$0 sm:$0xff] }
 0xc2c   : > { %v2150_v2 = vpop.xlane.xlu0 %2149 }
 0xc2d   : > { %v2151_v4 = vsub.f32 %v2147_v59, %v2150_v2  ;;  %v2779_v59 = vld [vmem:[%s3523_s28 + $0x18] sm:$0xff] }
 0xc2e   : > { %2333 = vmatpush.bf16.msra.mxu2 %v2779_v59 }
 0xc2f   : > { %v2152_v6 = vmul.f32 1.442695, %v2151_v4 }
 0xc31   : > { %2891 = vpow2.f32 %v2152_v6 }
 0xc32   : > { %2334 = vmatpush.bf16.msra.mxu2 %v2778_v60 }
 0xc33   : > { %v2094_v42 = vpop.xlane.xlu2 %2093 }
 0xc34   : > { %2893 = vrcp.f32 %v2094_v42 }
 0xc36   : > { %2335 = vmatpush.bf16.msra.mxu2 %v2777_v61 }
 0xc37   : > { %v2892_v7 = vpop.eup %2891 }
 0xc38   : > { %v2154_v8 = vsel %vm1447_vm4, %v2892_v7, 0.0 }
 0xc39   : > { %2155 = vadd.xlane.f32.xlu2 %v2154_v8 }
 0xc3a   : > { %v2894_v10 = vpop.eup %2893 }
 0xc3b   : > { %v2096_v12 = vmul.f32 %v2894_v10, %v2890_v62  ;;  %v2776_v62 = vld [vmem:[%s3523_s28] sm:$0xff] }
 0xc3c   : > { %2336 = vmatpush.bf16.msra.mxu2 %v2776_v62 }
 0xc3d   : > { %v2097_v16 = vpack.c.bf16 %v2096_v12, %v2096_v12 }
 0xc51   : > { %2099 = vrot.lane.b32.xlu2 %v3363_v5, %s2973_s16  ;;  %v2773_v5 = vld [vmem:[%s3518_s18 + $0x8] sm:$0xff]  ;;  %s3520_s16 = sld [smem:[#allocation22_spill]] }
 0xc52   : > { %2203 = vmatpush.bf16.msra.mxu0 %v2773_v5 }
 0xc56   : > { %2204 = vmatpush.bf16.msra.mxu0 %v2772_v17 }
 0xc57   : > { %v2775_v43 = vld [vmem:[%s3520_s16 + $0x8] sm:$0xff]  ;;  %v2774_v44 = vld [vmem:[%s3520_s16] sm:$0xff] }
 0xcac   : > { %v2156_v9 = vpop.xlane.xlu2 %2155 }
 0xcad   : > { %2895 = vrcp.f32 %v2156_v9 }
 0xcb3   : > { %v2896_v11 = vpop.eup %2895 }
 0xcb4   : > { %v2158_v13 = vmul.f32 %v2896_v11, %v2892_v7  ;;  %v2100_v45 = vpop.permute.xlu2 %2099 }
 0xcb5   : > { %v2105_v14 = vsel %vm1465_vm5, %v2100_v45, 0 }
 0xcb6   : > { %v2159_v15 = vpack.c.bf16 %v2158_v13, %v2158_v13  ;;  %2114 = vmatpush.bf16.msrb.mxu1 %v2105_v14  ;;  %2170 = vmatpush.bf16.msrb.mxu3 %v2105_v14 }
 0xcb9   : > { %2712 = vmatmul.msk.bf16.vlgmr.msrb.gmra.mxu1 %vm1447_vm4, %v2097_v16  ;;  %2714 = vmatmul.msk.bf16.vlgmr.msrb.gmra.mxu3 %vm1447_vm4, %v2159_v15  ;;  %v2859_v15 = vld [vmem:[%s3525_s2] ss:$0 sm:$0xff] }
 0xcba   : > { %2282 = vmatpush.bf16.msra.mxu1 %v2775_v43 }
 0xcbe   : > { %2283 = vmatpush.bf16.msra.mxu1 %v2774_v44  ;;  %v2428_v44 = vld [vmem:[%s1290_s22] sm:$0xff] }
 0xcbf   : > { %vm2429_vm0 = vcmp.ge.s32.totalorder %v2428_v44, 0 }
 0xd36   : > { %v2116_v19 = vpop.f32.mrf.mxu1 }
 0xd37   : > { %v2120_v23 = vsel %vm1483_vm9, %v2116_v19, 0.0 }
 0xd3c   : > { %v2172_v22 = vpop.f32.mrf.mxu3 }
 0xd3d   : > { %v2176_v24 = vsel %vm3281_vm10, %v2172_v22, 0.0 }
 0xd3e   : > { %v2177_v25 = vadd.f32 %v2176_v24, %v2120_v23  ;;  %v2118_v32 = vpop.f32.mrf.mxu1  ;;  %v2413_v23 = vsel %vm1396_vm1, %v2383_v3, 0  ;;  %v2907_v24 = vld [vmem:[%s3012_s25 + $0x68] sm:$0xff]  ;;  %v2381_v3 = vpack.c.bf16 %v2909_v0, %v2910_v1 }
 0xd3f   : > { %2415 = vmatpush.bf16.xpose.msra.mxu3 %v2413_v23 }
 0xd40   : > { %v2178_v26 = vpack.c.bf16 %v2177_v25, %v2177_v25  ;;  %v2908_v25 = vld [vmem:[%s3012_s25 + $0x60] sm:$0xff] }
 0xd41   : > { %v2382_v32 = vpack.c.bf16 %v2907_v24, %v2908_v25 }
 0xd42   : > { %2723 = vmatmul.msk.bf16.vlgmr.msra.gmra.mxu0 %vm1396_vm1, %v2178_v26 }
 0xd44   : > { %v2174_v28 = vpop.f32.mrf.mxu3 }
 0xdbf   : > { %v2206_v30 = vpop.f32.mrf.mxu0 }
 0xdc0   : > { %v2207_v31 = vadd.f32 %v2855_v29, %v2206_v30  ;;  %v2410_v29 = vsel %vm1396_vm1, %v2382_v32, 0 }
 0xdc1   : > { %2416 = vmatpush.bf16.xpose.msra.mxu3 %v2410_v29 }
 0xdc2   : > { %v2210_v33 = vadd.f32 %v2207_v31, %v3380_v41 }
 0xdc4   : > { %v2213_v34 = vsel %vm1396_vm1, %v2210_v33, 0.0 }
 0xdc5   : > { %2214 = vadd.xlane.f32.xlu0 %v2213_v34  ;;  %v2407_v34 = vsel %vm1396_vm1, %v2381_v3, 0 }
 0xdc7   : > { %v2208_v35 = vpop.f32.mrf.mxu0 }
 0xdc8   : > { %v2911_v35 = vld [vmem:[%s3012_s25 + $0x48] sm:$0xff] }
 0xdc9   : > { %2417 = vmatpush.bf16.xpose.msra.mxu3 %v2407_v34 }
 0xe38   : > { %v2215_v36 = vpop.xlane.xlu0 %2214 }
 0xe39   : > { %v2216_v18 = vmul.f32 %v2215_v36, %v3308_v53  ;;  %v2912_v36 = vld [vmem:[%s3012_s25 + $0x40] sm:$0xff] }
 0xe3b   : > { %v2217_v37 = vsub.f32 %v2210_v33, %v2216_v18  ;;  %v2380_v18 = vpack.c.bf16 %v2911_v35, %v2912_v36 }
 0xe3d   : > { %v2218_v38 = vmul.f32 %v2217_v37, %v2217_v37 }
 0xe3f   : > { %v2219_v39 = vsel %vm1396_vm1, %v2218_v38, 0.0  ;;  %v2913_v38 = vld [vmem:[%s3012_s25 + $0x38] sm:$0xff] }
 0xe40   : > { %2220 = vadd.xlane.f32.xlu1 %v2219_v39  ;;  %v2914_v39 = vld [vmem:[%s3012_s25 + $0x30] sm:$0xff] }
 0xe41   : > { %v2379_v43 = vpack.c.bf16 %v2913_v38, %v2914_v39 }
 0xeb3   : > { %v2221_v46 = vpop.xlane.xlu1 %2220 }
 0xeb4   : > { %v2222_v41 = vmul.f32 %v2221_v46, %v3308_v53  ;;  %v2401_v46 = vsel %vm1396_vm1, %v2379_v43, 0 }
 0xeb6   : > { %v2223_v20 = vadd.f32 1e-05, %v2222_v41  ;;  %v2915_v41 = vld [vmem:[%s3012_s25 + $0x28] sm:$0xff] }
 0xeb8   : > { %2897 = vrsqrt.f32 %v2223_v20  ;;  %vm2230_vm4 = vweird.f32 %v2223_v20 }
 0xebe   : > { %v2898_v47 = vpop.eup %2897 }
 0xebf   : > { %v2225_v27 = vmul.f32 %v2898_v47, %v2223_v20  ;;  %vm2231_vm2 = vweird.f32 %v2898_v47  ;;  %v2916_v20 = vld [vmem:[%s3012_s25 + $0x20] sm:$0xff] }
 0xec0   : > { %vm2232_vm5 = vmor %vm2230_vm4, %vm2231_vm2 }
 0xec1   : > { %v2226_v48 = vmul.f32 %v2898_v47, %v2225_v27 }
 0xec3   : > { %v2227_v49 = vmul.f32 0.5, %v2226_v48  ;;  %v2917_v48 = vld [vmem:[%s3012_s25 + $0x18] sm:$0xff] }
 0xec5   : > { %v2228_v50 = vsub.f32 1.5, %v2227_v49  ;;  %v2918_v49 = vld [vmem:[%s3012_s25 + $0x10] sm:$0xff] }
 0xec7   : > { %v2229_v40 = vmul.f32 %v2898_v47, %v2228_v50  ;;  %v2377_v50 = vpack.c.bf16 %v2917_v48, %v2918_v49 }
 0xec9   : > { %v2233_v52 = vsel %vm2232_vm5, %v2898_v47, %v2229_v40  ;;  %v2378_v47 = vpack.c.bf16 %v2915_v41, %v2916_v20  ;;  %v2395_v40 = vsel %vm1396_vm1, %v2377_v50, 0 }
 0xeca   : > { %v2234_v55 = vmul.f32 %v2233_v52, %v2217_v37  ;;  %v2404_v37 = vsel %vm1396_vm1, %v2380_v18, 0  ;;  %v2920_v52 = vld [vmem:[%s3012_s25] sm:$0xff] }
 0xecb   : > { %2418 = vmatpush.bf16.xpose.msra.mxu3 %v2404_v37  ;;  %v2398_v27 = vsel %vm1396_vm1, %v2378_v47, 0 }
 0xecc   : > { %v2238_v56 = vmul.f32 %v2856_v51, %v2234_v55  ;;  %v2919_v51 = vld [vmem:[%s3012_s25 + $0x8] sm:$0xff] }
 0xece   : > { %v2242_v57 = vadd.f32 %v2857_v54, %v2238_v56  ;;  %v2376_v54 = vpack.c.bf16 %v2919_v51, %v2920_v52 }
 0xed0   : > { %v2257_v58 = vpack.c.bf16 %v2242_v57, %v2242_v57  ;;  %v2392_v55 = vsel %vm1396_vm1, %v2376_v54, 0 }
 0xed2   : > { %2732 = vmatmul.msk.bf16.vlgmr.msra.gmra.mxu1 %vm1396_vm1, %v2257_v58 }
 0xed3   : > { %2419 = vmatpush.bf16.xpose.msra.mxu3 %v2401_v46 }
 0xedb   : > { %2420 = vmatpush.bf16.xpose.msra.mxu3 %v2398_v27 }
 0xee3   : > { %2421 = vmatpush.bf16.xpose.msra.mxu3 %v2395_v40 }
 0xeeb   : > { %2422 = vmatpush.bf16.xpose.msra.mxu3 %v2392_v55 }
 0xf4f   : > { %v2285_v2 = vpop.f32.mrf.mxu1 }
 0xf50   : > { %v2286_v4 = vadd.f32 %v2858_v63, %v2285_v2 }
 0xf52   : > { %v2289_v6 = vmul.f32 %v2286_v4, %v2286_v4 }
 0xf54   : > { %v2290_v7 = vmul.f32 %v2289_v6, %v2286_v4 }
 0xf56   : > { %v2291_v8 = vmul.f32 0.044715, %v2290_v7 }
 0xf57   : > { %v2287_v42 = vpop.f32.mrf.mxu1 }
 0xf58   : > { %v2292_v9 = vadd.f32 %v2291_v8, %v2286_v4  ;;  %v2861_v8 = vld [vmem:[%s3182_s20] ss:$0 sm:$0xff] }
 0xf5a   : > { %v2293_v10 = vmul.f32 0.7978846, %v2292_v9 }
 0xf5c   : > { %2899 = vtanh.f32 %v2293_v10 }
 0xf62   : > { %v2900_v11 = vpop.eup %2899 }
 0xf63   : > { %v2295_v12 = vadd.f32 1.0, %v2900_v11 }
 0xf65   : > { %v2296_v13 = vmul.f32 0.5, %v2295_v12 }
 0xf67   : > { %v2297_v45 = vmul.f32 %v2296_v13, %v2286_v4  ;;  %v2860_v4 = vld [vmem:[%s3177_s21] ss:$0 sm:$0xff] }
 0xf69   : > { %v2298_v14 = vpack.c.bf16 %v2297_v45, %v2297_v45 }
 0xf6b   : > { %2749 = vmatmul.msk.bf16.vlgmr.msra.gmra.mxu2 %vm1704_vm3, %v2298_v14  ;;  %vm2467_vm3 = vcmp.eq.s32.totalorder %v3237_v21, 1 }
 0xfee   : > { %v2338_v16 = vpop.f32.mrf.mxu2 }
 0xfef   : > { %v2339_v5 = vadd.f32 %v2859_v15, %v2338_v16 }
 0xff1   : > { %v2342_v17 = vadd.f32 %v2339_v5, %v2242_v57 }
 0xff3   : > { %v2345_v19 = vsel %vm1396_vm1, %v2342_v17, 0.0 }
 0xff4   : > { %2346 = vadd.xlane.f32.xlu2 %v2345_v19  ;;  %v2978_v19 = vmov 0.0  }
 0xff6   : > { %v2340_v22 = vpop.f32.mrf.mxu2 }
 0xff7   : > { %v2751_v22 = vsel %vm2429_vm0, 1.0, %v2978_v19 }
0x1067   : > { %v2347_v26 = vpop.xlane.xlu2 %2346 }
0x1068   : > { %v2348_v28 = vmul.f32 %v2347_v26, %v3308_v53 }
0x106a   : > { %v2349_v30 = vsub.f32 %v2342_v17, %v2348_v28 }
0x106c   : > { %v2350_v31 = vmul.f32 %v2349_v30, %v2349_v30 }
0x106e   : > { %v2351_v33 = vsel %vm1396_vm1, %v2350_v31, 0.0 }
0x106f   : > { %2352 = vadd.xlane.f32.xlu0 %v2351_v33 }
0x1083   : > { %2433 = vperm.xlu0 %2838, %v2428_v44  }
0x10e2   : > { %v2353_v56 = vpop.xlane.xlu0 %2352 }
0x10e3   : > { %v2354_v57 = vmul.f32 %v2353_v56, %v3308_v53  ;;  %v2862_v53 = vld [vmem:[%s3187_s6] ss:$0 sm:$0xff] }
0x10e5   : > { %v2355_v58 = vadd.f32 1e-05, %v2354_v57 }
0x10e7   : > { %2901 = vrsqrt.f32 %v2355_v58  ;;  %vm2362_vm10 = vweird.f32 %v2355_v58 }
0x10ed   : > { %v2902_v59 = vpop.eup %2901 }
0x10ee   : > { %v2357_v60 = vmul.f32 %v2902_v59, %v2355_v58  ;;  %vm2363_vm9 = vweird.f32 %v2902_v59 }
0x10ef   : > { %vm2364_vm14 = vmor %vm2362_vm10, %vm2363_vm9 }
0x10f0   : > { %v2358_v61 = vmul.f32 %v2902_v59, %v2357_v60 }
0x10f2   : > { %v2359_v62 = vmul.f32 0.5, %v2358_v61 }
0x10f4   : > { %v2360_v63 = vsub.f32 1.5, %v2359_v62 }
0x10f5   : > { %v2434_v5 = vpop.permute.xlu0 %2433 }
0x10f6   : > { %v2361_v2 = vmul.f32 %v2902_v59, %v2360_v63  ;;  %vm2435_vm15 = vcmp.eq.s32.totalorder %v3237_v21, %v2434_v5 }
0x10f8   : > { %v2365_v6 = vsel %vm2364_vm14, %v2902_v59, %v2361_v2 }
0x10f9   : > { %v2366_v7 = vmul.f32 %v2365_v6, %v2349_v30 }
0x10fb   : > { %v2370_v42 = vmul.f32 %v2860_v4, %v2366_v7 }
0x10fd   : > { %v2374_v9 = vadd.f32 %v2861_v8, %v2370_v42 }
0x10ff   : > { %v2375_v10 = vpack.c.bf16 %v2374_v9, %v2374_v9 }
0x1101   : > { %2750 = vmatmul.msk.bf16.vlgmr.msra.gmra.mxu3 %vm1396_vm1, %v2375_v10  ;;  %vm2451_vm1 = vcmask 7168  }
0x1102   : > { %v2459_v23 = vsel %vm2451_vm1, %v2751_v22, 0.0 }
0x1103   : > { %v2460_v24 = vrot.slane %v2459_v23, 4 }
0x1105   : > { %v2461_v25 = vadd.f32 %v2460_v24, %v2459_v23 }
0x1107   : > { %v2462_v32 = vrot.slane %v2461_v25, 2 }
0x1109   : > { %v2463_v26 = vadd.f32 %v2462_v32, %v2461_v25 }
0x110b   : > { %v2464_v28 = vrot.slane %v2463_v26, 1 }
0x110d   : > { %v2465_v29 = vadd.f32 %v2464_v28, %v2463_v26 }
0x1184   : > { %v2424_v11 = vpop.f32.mrf.mxu3 }
0x1185   : > { %v2425_v12 = vadd.f32 %v2862_v53, %v2424_v11 }
0x1187   : > { %2439 = vmax.xlane.f32.xlu1 %v2425_v12  ;;  %v2436_v17 = vsel %vm2435_vm15, %v2425_v12, 0.0 }
0x118c   : > { %v2426_v13 = vpop.f32.mrf.mxu3 }
0x11fa   : > { %v2440_v45 = vpop.xlane.xlu1 %2439 }
0x11fb   : > { %v2441_v14 = vsub.f32 %v2425_v12, %v2440_v45 }
0x11fd   : > { %v2442_v15 = vmul.f32 1.442695, %v2441_v14 }
0x11ff   : > { %2903 = vpow2.f32 %v2442_v15 }
0x1205   : > { %v2904_v16 = vpop.eup %2903 }
0x1206   : > { %2444 = vadd.xlane.f32.xlu1 %v2904_v16 }
0x120e   : > { %2437 = vadd.xlane.f32.xlu1 %v2436_v17 }
0x1227   : > { %2470 = vperm.xlu1 %2840, %v2465_v29  }
0x1279   : > { %v2445_v30 = vpop.xlane.xlu1 %2444 }
0x127a   : > { %2905 = vlog2.f32 %v2445_v30 }
0x1280   : > { %v2906_v31 = vpop.eup %2905 }
0x1281   : > { %v2447_v0 = vmul.f32 0.6931472, %v2906_v31  ;;  %v2438_v3 = vpop.xlane.xlu1 %2437 }
0x1283   : > { %v2448_v1 = vadd.f32 %v2447_v0, %v2440_v45 }
0x1285   : > { %v2449_v33 = vsub.f32 %v2448_v1, %v2438_v3 }
0x1287   : > { %v2450_v34 = vmul.f32 %v2751_v22, %v2449_v33 }
0x1289   : > { %v2452_v35 = vsel %vm2451_vm1, %v2450_v34, 0.0 }
0x128a   : > { %v2453_v36 = vrot.slane %v2452_v35, 4 }
0x128c   : > { %v2454_v18 = vadd.f32 %v2453_v36, %v2452_v35 }
0x128e   : > { %v2455_v37 = vrot.slane %v2454_v18, 2 }
0x1290   : > { %v2456_v38 = vadd.f32 %v2455_v37, %v2454_v18 }
0x1292   : > { %v2457_v39 = vrot.slane %v2456_v38, 1 }
0x1294   : > { %v2458_v43 = vadd.f32 %v2457_v39, %v2456_v38 }
0x1296   : > { %2476 = vperm.xlu0 %2838, %v2458_v43  }
0x1299   : > { %v2471_v44 = vpop.permute.xlu1 %2470 }
0x129a   : > { %v2473_v46 = vsel %vm2467_vm3, %v2471_v44, 0.0 }
0x1308   : > { %v2477_v41 = vpop.permute.xlu0 %2476 }
0x1309   : > { %v2479_v20 = vsel %vm2466_vm6, %v2477_v41, %v2473_v46 }
0x130a   : > { %2480 = vst [vmem:[%s1293_s0] sm:$0x1] %v2479_v20 }
0x130b PF: > { %s93_s7 = sadd.s32 1, %s2927_s7  }
0x130c   : > { %p90_p4 = scmp.ge.s32.totalorder %s93_s7, 4  }
0x130e   :  { %92 = sbr.rel (!%p90_p4) target bundleno = 71 (0x47), region = 267 }

</bundles_post_ra>
